<compile_context>
chip_gen: v7x
topology: tpu7x:2x2x1
jax: 0.10.0
libtpu: 0.0.40
codegen_flags: <defaults>
</compile_context>

<pallas_src>
import jax
import jax.numpy as jnp
from jax.experimental import pallas as pl
from jax.experimental.pallas import tpu as pltpu

# ----------------------------- model config (small, synthetic) -----------------------------
BATCH = 2
CHANNELS = 3
IMG = 16
PATCH = 8
N_SIDE = IMG // PATCH                  # 2 -> 4 patches
NUM_PATCHES = N_SIDE * N_SIDE
SEQ = NUM_PATCHES + 1                  # +1 CLS token
SEQ_PAD = 8                            # sublane-aligned sequence length
WIDTH = 32                             # transformer width
HEADS = 4
HEAD_DIM = WIDTH // HEADS
MLP_DIM = 4 * WIDTH
LAYERS = 2
EMBED_DIM = 16                         # output projection dim
LANE_PAD = 128                         # lane-dense width of the kernel output
PATCH_DIM = CHANNELS * PATCH * PATCH   # 192
DTYPE = jnp.float32
LN_EPS = 1e-5


# ----------------------------- fused encoder kernel (one image per grid step) -----------------------------
def _vit_encoder_kernel(
    # inputs
    patches_ref, conv_w_ref, cls_pos_ref, ln_pre_g_ref, ln_pre_b_ref,
    ln1_g_ref, ln1_b_ref, qkv_w_ref, qkv_b_ref, out_w_ref, out_b_ref,
    ln2_g_ref, ln2_b_ref, fc_w_ref, fc_b_ref, proj_w_ref, proj_b_ref,
    ln_post_g_ref, ln_post_b_ref, head_proj_ref,
    # outputs
    o_ref,
):
    f32 = jnp.float32

    def mm(a, b):
        # bf16 MXU matmul, f32 accumulation.
        return jnp.dot(a.astype(jnp.bfloat16), b.astype(jnp.bfloat16),
                       preferred_element_type=f32)

    def mm_nt(a, b):
        # a @ b.T without materializing a transpose (contract dim 1 of both).
        return jax.lax.dot_general(
            a.astype(jnp.bfloat16), b.astype(jnp.bfloat16),
            dimension_numbers=(((1,), (1,)), ((), ())),
            preferred_element_type=f32)

    def ln(x, g, b):
        g = g.astype(f32)
        b = b.astype(f32)
        mu = jnp.mean(x, axis=-1, keepdims=True)
        var = jnp.mean((x - mu) ** 2, axis=-1, keepdims=True)
        return (x - mu) * jax.lax.rsqrt(var + LN_EPS) * g + b

    # ---- patch embedding (conv1, bias=False) + CLS token + positional embedding ----
    # patches_ref row 0 and rows SEQ..SEQ_PAD-1 are zero; cls_pos carries
    # class_emb+pos[0] in row 0, pos[1:SEQ] in rows 1..SEQ-1, zeros in padding.
    x = mm(patches_ref[0], conv_w_ref[...]) + cls_pos_ref[...].astype(f32)  # (SEQ_PAD, WIDTH)

    # ---- ln_pre ----
    x = ln(x, ln_pre_g_ref[...], ln_pre_b_ref[...])

    # key-padding bias: padded key columns (>= SEQ) pushed to -1e30 pre-softmax.
    key_col = jax.lax.broadcasted_iota(jnp.int32, (1, SEQ_PAD), 1)
    key_bias = jnp.where(key_col < SEQ, 0.0, -1e30).astype(f32)             # (1, SEQ_PAD)

    scale = 1.0 / float(HEAD_DIM) ** 0.5
    for layer in range(LAYERS):
        # -------- multi-head self-attention sublayer --------
        h = ln(x, ln1_g_ref[layer], ln1_b_ref[layer])
        qkv = mm(h, qkv_w_ref[layer]) + qkv_b_ref[layer].astype(f32)        # (SEQ_PAD, 3W)
        q_all = qkv[:, 0:WIDTH] * scale                                     # fold 1/sqrt(d) into q
        k_all = qkv[:, WIDTH:2 * WIDTH]
        v_all = qkv[:, 2 * WIDTH:3 * WIDTH]

        # Tiny per-head q@k^T matmuls stay unrolled (MXU pushes are filler);
        # the HEADS score blocks are stacked along sublanes so the softmax
        # VPU/XLU/EUP work runs ONCE for all heads.
        s = jnp.concatenate(
            [mm_nt(q_all[:, hh * HEAD_DIM:(hh + 1) * HEAD_DIM],
                   k_all[:, hh * HEAD_DIM:(hh + 1) * HEAD_DIM])
             for hh in range(HEADS)], axis=0)                               # (HEADS*SEQ_PAD, SEQ_PAD)
        s = s + key_bias                                                    # mask padded keys
        s = s - jnp.max(s, axis=-1, keepdims=True)
        p = jnp.exp(s)
        p = p * pl.reciprocal(jnp.sum(p, axis=-1, keepdims=True), approx=True)

        # per-head p@v, heads merged along lanes -> ONE output-projection matmul
        ctx = jnp.concatenate(
            [mm(p[hh * SEQ_PAD:(hh + 1) * SEQ_PAD, :],
                v_all[:, hh * HEAD_DIM:(hh + 1) * HEAD_DIM])
             for hh in range(HEADS)], axis=1)                               # (SEQ_PAD, WIDTH)
        x = x + mm(ctx, out_w_ref[layer]) + out_b_ref[layer].astype(f32)    # residual

        # -------- MLP sublayer --------
        h = ln(x, ln2_g_ref[layer], ln2_b_ref[layer])
        h = mm(h, fc_w_ref[layer]) + fc_b_ref[layer].astype(f32)            # (SEQ_PAD, MLP_DIM)
        h = h * jax.nn.sigmoid(1.702 * h)                                   # QuickGELU (OpenAI CLIP)
        x = x + mm(h, proj_w_ref[layer]) + proj_b_ref[layer].astype(f32)    # residual

    # ---- CLS token (row 0) -> ln_post -> output projection (128-lane padded, no bias) ----
    cls_tok = ln(x[0:1, :], ln_post_g_ref[...], ln_post_b_ref[...])         # (1, WIDTH)
    o_ref[0] = mm(cls_tok, head_proj_ref[...]).astype(o_ref.dtype)          # (1, LANE_PAD)


# ----------------------------- parameter init (deterministic, synthetic) -----------------------------
def init_params(key):
    ks = iter(jax.random.split(key, 32))

    def w(shape, dtype=jnp.bfloat16, scale=0.02):
        # matmul weights stored bf16 (halves DMA, MXU-native); everything else f32
        return (jax.random.normal(next(ks), shape, jnp.float32) * scale).astype(dtype)

    return {
        "conv_w": w((PATCH_DIM, WIDTH)),                       # conv1 (bias=False in CLIP)
        "class_emb": w((1, WIDTH), jnp.float32),
        "pos_emb": w((SEQ, WIDTH), jnp.float32),
        "ln_pre_g": jnp.ones((1, WIDTH), jnp.float32),
        "ln_pre_b": jnp.zeros((1, WIDTH), jnp.float32),
        "ln_post_g": jnp.ones((1, WIDTH), jnp.float32),
        "ln_post_b": jnp.zeros((1, WIDTH), jnp.float32),
        "head_proj": w((WIDTH, EMBED_DIM)),                    # image projection (no bias)
        # per-layer weights stacked along a leading LAYERS axis
        "ln1_g": jnp.ones((LAYERS, 1, WIDTH), jnp.float32),
        "ln1_b": jnp.zeros((LAYERS, 1, WIDTH), jnp.float32),
        "qkv_w": w((LAYERS, WIDTH, 3 * WIDTH)),
        "qkv_b": jnp.zeros((LAYERS, 1, 3 * WIDTH), jnp.float32),
        "out_w": w((LAYERS, WIDTH, WIDTH)),
        "out_b": jnp.zeros((LAYERS, 1, WIDTH), jnp.float32),
        "ln2_g": jnp.ones((LAYERS, 1, WIDTH), jnp.float32),
        "ln2_b": jnp.zeros((LAYERS, 1, WIDTH), jnp.float32),
        "fc_w": w((LAYERS, WIDTH, MLP_DIM)),
        "fc_b": jnp.zeros((LAYERS, 1, MLP_DIM), jnp.float32),
        "proj_w": w((LAYERS, MLP_DIM, WIDTH)),
        "proj_b": jnp.zeros((LAYERS, 1, WIDTH), jnp.float32),
    }


# ----------------------------- forward (== CLIP ViT encode_image) -----------------------------
@jax.jit
def encode_image(params, images):
    B, C, H, W_img = images.shape
    assert B == BATCH and C == CHANNELS and H == IMG and W_img == IMG
    gh, gw = H // PATCH, W_img // PATCH

    # Patch-embedding conv (kernel==stride==PATCH) as patch extraction; the matmul
    # runs inside the fused kernel. Patches are pre-placed into an 8-row,
    # sublane-aligned slab: row 0 = CLS slot (zeros), rows 1..NUM_PATCHES = patches,
    # rows SEQ..SEQ_PAD-1 = padding (zeros).
    patches = images.reshape(B, C, gh, PATCH, gw, PATCH)
    patches = patches.transpose(0, 2, 4, 1, 3, 5).reshape(B, gh * gw, PATCH_DIM)
    patches_pad = jnp.zeros((B, SEQ_PAD, PATCH_DIM), DTYPE)
    patches_pad = patches_pad.at[:, 1:1 + NUM_PATCHES, :].set(patches)

    # CLS + positional embedding, pre-assembled into the same 8-row layout.
    cls_pos = jnp.zeros((SEQ_PAD, WIDTH), jnp.float32)
    cls_pos = cls_pos.at[:SEQ, :].set(params["pos_emb"])
    cls_pos = cls_pos.at[0, :].add(params["class_emb"][0])

    # Zero-pad the final projection to 128 lanes so the kernel output is lane-dense.
    head_proj_pad = jnp.zeros((WIDTH, LANE_PAD), jnp.bfloat16)
    head_proj_pad = head_proj_pad.at[:, :EMBED_DIM].set(params["head_proj"])

    def rep(shape):
        # weight replicated across the batch grid: same block every step (stays resident)
        return pl.BlockSpec(shape, lambda b: (0,) * len(shape))

    out_pad = pl.pallas_call(
        _vit_encoder_kernel,
        grid=(B,),
        in_specs=[
            pl.BlockSpec((1, SEQ_PAD, PATCH_DIM), lambda b: (b, 0, 0)),   # patches (per image)
            rep((PATCH_DIM, WIDTH)),                                      # conv_w
            rep((SEQ_PAD, WIDTH)),                                        # cls + pos slab
            rep((1, WIDTH)), rep((1, WIDTH)),                             # ln_pre g/b
            rep((LAYERS, 1, WIDTH)), rep((LAYERS, 1, WIDTH)),             # ln1 g/b
            rep((LAYERS, WIDTH, 3 * WIDTH)), rep((LAYERS, 1, 3 * WIDTH)), # qkv w/b
            rep((LAYERS, WIDTH, WIDTH)), rep((LAYERS, 1, WIDTH)),         # out w/b
            rep((LAYERS, 1, WIDTH)), rep((LAYERS, 1, WIDTH)),             # ln2 g/b
            rep((LAYERS, WIDTH, MLP_DIM)), rep((LAYERS, 1, MLP_DIM)),     # fc w/b
            rep((LAYERS, MLP_DIM, WIDTH)), rep((LAYERS, 1, WIDTH)),       # proj w/b
            rep((1, WIDTH)), rep((1, WIDTH)),                             # ln_post g/b
            rep((WIDTH, LANE_PAD)),                                       # head projection (padded)
        ],
        out_specs=pl.BlockSpec((1, 1, LANE_PAD), lambda b: (b, 0, 0)),
        out_shape=jax.ShapeDtypeStruct((B, 1, LANE_PAD), DTYPE),
        compiler_params=pltpu.CompilerParams(
            dimension_semantics=("parallel",),          # v7x: one image per TensorCore
            vmem_limit_bytes=32 * 1024 * 1024),
    )(
        patches_pad, params["conv_w"], cls_pos,
        params["ln_pre_g"], params["ln_pre_b"],
        params["ln1_g"], params["ln1_b"], params["qkv_w"], params["qkv_b"],
        params["out_w"], params["out_b"], params["ln2_g"], params["ln2_b"],
        params["fc_w"], params["fc_b"], params["proj_w"], params["proj_b"],
        params["ln_post_g"], params["ln_post_b"], head_proj_pad,
    )
    return out_pad.reshape(B, LANE_PAD)[:, :EMBED_DIM]                     # (B, EMBED_DIM)


# ----------------------------- main -----------------------------
if __name__ == "__main__":
    key = jax.random.PRNGKey(0)
    pkey, xkey = jax.random.split(key)
    params = init_params(pkey)
    images = jax.random.normal(xkey, (BATCH, CHANNELS, IMG, IMG), DTYPE)

    features = encode_image(params, images)
    jax.block_until_ready(features)
    assert features.shape == (BATCH, EMBED_DIM)
    assert bool(jnp.all(jnp.isfinite(features)))
    print("KERNEL_OK")
</pallas_src>

<mosaic_0001>
module attributes {stable_mosaic.version = 11 : i64} {
  func.func @_vit_encoder_kernel(%arg0: i32, %arg1: memref<1x8x192xf32, #tpu.memory_space<vmem>>, %arg2: memref<192x32xbf16, #tpu.memory_space<vmem>>, %arg3: memref<8x32xf32, #tpu.memory_space<vmem>>, %arg4: memref<1x32xf32, #tpu.memory_space<vmem>>, %arg5: memref<1x32xf32, #tpu.memory_space<vmem>>, %arg6: memref<2x1x32xf32, #tpu.memory_space<vmem>>, %arg7: memref<2x1x32xf32, #tpu.memory_space<vmem>>, %arg8: memref<2x32x96xbf16, #tpu.memory_space<vmem>>, %arg9: memref<2x1x96xf32, #tpu.memory_space<vmem>>, %arg10: memref<2x32x32xbf16, #tpu.memory_space<vmem>>, %arg11: memref<2x1x32xf32, #tpu.memory_space<vmem>>, %arg12: memref<2x1x32xf32, #tpu.memory_space<vmem>>, %arg13: memref<2x1x32xf32, #tpu.memory_space<vmem>>, %arg14: memref<2x32x128xbf16, #tpu.memory_space<vmem>>, %arg15: memref<2x1x128xf32, #tpu.memory_space<vmem>>, %arg16: memref<2x128x32xbf16, #tpu.memory_space<vmem>>, %arg17: memref<2x1x32xf32, #tpu.memory_space<vmem>>, %arg18: memref<1x32xf32, #tpu.memory_space<vmem>>, %arg19: memref<1x32xf32, #tpu.memory_space<vmem>>, %arg20: memref<32x128xbf16, #tpu.memory_space<vmem>>, %arg21: memref<1x1x128xf32, #tpu.memory_space<vmem>>) attributes {dimension_semantics = [#tpu.dimension_semantics<parallel>], iteration_bounds = array<i64: 2>, scalar_prefetch = 0 : i64, scratch_operands = 0 : i64, tpu.core_type = #tpu.core_type<tc>, window_params = [{transform_indices = @transform_0, window_bounds = array<i64: 1, 8, 192>}, {pipeline_mode = #tpu.pipeline_mode<synchronous>, transform_indices = @transform_1, window_bounds = array<i64: 192, 32>}, {pipeline_mode = #tpu.pipeline_mode<synchronous>, transform_indices = @transform_2, window_bounds = array<i64: 8, 32>}, {pipeline_mode = #tpu.pipeline_mode<synchronous>, transform_indices = @transform_3, window_bounds = array<i64: 1, 32>}, {pipeline_mode = #tpu.pipeline_mode<synchronous>, transform_indices = @transform_4, window_bounds = array<i64: 1, 32>}, {pipeline_mode = #tpu.pipeline_mode<synchronous>, transform_indices = @transform_5, window_bounds = array<i64: 2, 1, 32>}, {pipeline_mode = #tpu.pipeline_mode<synchronous>, transform_indices = @transform_6, window_bounds = array<i64: 2, 1, 32>}, {pipeline_mode = #tpu.pipeline_mode<synchronous>, transform_indices = @transform_7, window_bounds = array<i64: 2, 32, 96>}, {pipeline_mode = #tpu.pipeline_mode<synchronous>, transform_indices = @transform_8, window_bounds = array<i64: 2, 1, 96>}, {pipeline_mode = #tpu.pipeline_mode<synchronous>, transform_indices = @transform_9, window_bounds = array<i64: 2, 32, 32>}, {pipeline_mode = #tpu.pipeline_mode<synchronous>, transform_indices = @transform_10, window_bounds = array<i64: 2, 1, 32>}, {pipeline_mode = #tpu.pipeline_mode<synchronous>, transform_indices = @transform_11, window_bounds = array<i64: 2, 1, 32>}, {pipeline_mode = #tpu.pipeline_mode<synchronous>, transform_indices = @transform_12, window_bounds = array<i64: 2, 1, 32>}, {pipeline_mode = #tpu.pipeline_mode<synchronous>, transform_indices = @transform_13, window_bounds = array<i64: 2, 32, 128>}, {pipeline_mode = #tpu.pipeline_mode<synchronous>, transform_indices = @transform_14, window_bounds = array<i64: 2, 1, 128>}, {pipeline_mode = #tpu.pipeline_mode<synchronous>, transform_indices = @transform_15, window_bounds = array<i64: 2, 128, 32>}, {pipeline_mode = #tpu.pipeline_mode<synchronous>, transform_indices = @transform_16, window_bounds = array<i64: 2, 1, 32>}, {pipeline_mode = #tpu.pipeline_mode<synchronous>, transform_indices = @transform_17, window_bounds = array<i64: 1, 32>}, {pipeline_mode = #tpu.pipeline_mode<synchronous>, transform_indices = @transform_18, window_bounds = array<i64: 1, 32>}, {pipeline_mode = #tpu.pipeline_mode<synchronous>, transform_indices = @transform_19, window_bounds = array<i64: 32, 128>}, {transform_indices = @transform_20, window_bounds = array<i64: 1, 1, 128>}]} {
    %c0 = arith.constant 0 : index
    %c0_0 = arith.constant 0 : index
    %c0_1 = arith.constant 0 : index
    %0 = vector.load %arg1[%c0, %c0_0, %c0_1] : memref<1x8x192xf32, #tpu.memory_space<vmem>>, vector<1x8x192xf32>
    %1 = vector.shape_cast %0 : vector<1x8x192xf32> to vector<8x192xf32>
    %c0_2 = arith.constant 0 : index
    %c0_3 = arith.constant 0 : index
    %2 = vector.load %arg2[%c0_2, %c0_3] : memref<192x32xbf16, #tpu.memory_space<vmem>>, vector<192x32xbf16>
    %3 = arith.truncf %1 : vector<8x192xf32> to vector<8x192xbf16>
    %cst = arith.constant dense<0.000000e+00> : vector<8x32xf32>
    %4 = tpu.matmul %3, %2, %cst {dimension_numbers = #tpu.dot_dimension_numbers<[1], [0], [0], [1], [0, 0, 1, 1], [], []>} : vector<8x192xbf16>, vector<192x32xbf16>, vector<8x32xf32> -> vector<8x32xf32>
    %c0_4 = arith.constant 0 : index
    %c0_5 = arith.constant 0 : index
    %5 = vector.load %arg3[%c0_4, %c0_5] : memref<8x32xf32, #tpu.memory_space<vmem>>, vector<8x32xf32>
    %6 = arith.addf %4, %5 : vector<8x32xf32>
    %c0_6 = arith.constant 0 : index
    %c0_7 = arith.constant 0 : index
    %7 = vector.load %arg4[%c0_6, %c0_7] : memref<1x32xf32, #tpu.memory_space<vmem>>, vector<1x32xf32>
    %c0_8 = arith.constant 0 : index
    %c0_9 = arith.constant 0 : index
    %8 = vector.load %arg5[%c0_8, %c0_9] : memref<1x32xf32, #tpu.memory_space<vmem>>, vector<1x32xf32>
    %cst_10 = arith.constant dense<0.000000e+00> : vector<8xf32>
    %9 = vector.multi_reduction <add>, %6, %cst_10 [1] : vector<8x32xf32> to vector<8xf32>
    %10 = vector.shape_cast %9 : vector<8xf32> to vector<8x1xf32>
    %cst_11 = arith.constant 3.200000e+01 : f32
    %11 = vector.broadcast %cst_11 : f32 to vector<8x1xf32>
    %12 = arith.divf %10, %11 : vector<8x1xf32>
    %13 = vector.broadcast %12 : vector<8x1xf32> to vector<8x32xf32>
    %14 = arith.subf %6, %13 : vector<8x32xf32>
    %15 = arith.mulf %14, %14 : vector<8x32xf32>
    %cst_12 = arith.constant dense<0.000000e+00> : vector<8xf32>
    %16 = vector.multi_reduction <add>, %15, %cst_12 [1] : vector<8x32xf32> to vector<8xf32>
    %17 = vector.shape_cast %16 : vector<8xf32> to vector<8x1xf32>
    %cst_13 = arith.constant 3.200000e+01 : f32
    %18 = vector.broadcast %cst_13 : f32 to vector<8x1xf32>
    %19 = arith.divf %17, %18 : vector<8x1xf32>
    %20 = vector.broadcast %12 : vector<8x1xf32> to vector<8x32xf32>
    %21 = arith.subf %6, %20 : vector<8x32xf32>
    %cst_14 = arith.constant 9.99999974E-6 : f32
    %22 = vector.broadcast %cst_14 : f32 to vector<8x1xf32>
    %23 = arith.addf %19, %22 : vector<8x1xf32>
    %24 = math.rsqrt %23 : vector<8x1xf32>
    %25 = vector.broadcast %24 : vector<8x1xf32> to vector<8x32xf32>
    %26 = arith.mulf %21, %25 : vector<8x32xf32>
    %27 = vector.broadcast %7 : vector<1x32xf32> to vector<8x32xf32>
    %28 = arith.mulf %26, %27 : vector<8x32xf32>
    %29 = vector.broadcast %8 : vector<1x32xf32> to vector<8x32xf32>
    %30 = arith.addf %28, %29 : vector<8x32xf32>
    %31 = tpu.iota {dimensions = array<i32: 1>} : vector<1x8xi32>
    %c5_i32 = arith.constant 5 : i32
    %32 = vector.broadcast %c5_i32 : i32 to vector<1x8xi32>
    %33 = arith.cmpi slt, %31, %32 : vector<1x8xi32>
    %cst_15 = arith.constant 0.000000e+00 : f32
    %cst_16 = arith.constant -1.000000e+30 : f32
    %34 = vector.broadcast %cst_15 : f32 to vector<1x8xf32>
    %35 = vector.broadcast %cst_16 : f32 to vector<1x8xf32>
    %36 = arith.select %33, %34, %35 : vector<1x8xi1>, vector<1x8xf32>
    %c0_17 = arith.constant 0 : index
    %c0_18 = arith.constant 0 : index
    %c0_19 = arith.constant 0 : index
    %37 = vector.load %arg6[%c0_17, %c0_18, %c0_19] : memref<2x1x32xf32, #tpu.memory_space<vmem>>, vector<1x1x32xf32>
    %38 = vector.shape_cast %37 : vector<1x1x32xf32> to vector<1x32xf32>
    %c0_20 = arith.constant 0 : index
    %c0_21 = arith.constant 0 : index
    %c0_22 = arith.constant 0 : index
    %39 = vector.load %arg7[%c0_20, %c0_21, %c0_22] : memref<2x1x32xf32, #tpu.memory_space<vmem>>, vector<1x1x32xf32>
    %40 = vector.shape_cast %39 : vector<1x1x32xf32> to vector<1x32xf32>
    %cst_23 = arith.constant dense<0.000000e+00> : vector<8xf32>
    %41 = vector.multi_reduction <add>, %30, %cst_23 [1] : vector<8x32xf32> to vector<8xf32>
    %42 = vector.shape_cast %41 : vector<8xf32> to vector<8x1xf32>
    %cst_24 = arith.constant 3.200000e+01 : f32
    %43 = vector.broadcast %cst_24 : f32 to vector<8x1xf32>
    %44 = arith.divf %42, %43 : vector<8x1xf32>
    %45 = vector.broadcast %44 : vector<8x1xf32> to vector<8x32xf32>
    %46 = arith.subf %30, %45 : vector<8x32xf32>
    %47 = arith.mulf %46, %46 : vector<8x32xf32>
    %cst_25 = arith.constant dense<0.000000e+00> : vector<8xf32>
    %48 = vector.multi_reduction <add>, %47, %cst_25 [1] : vector<8x32xf32> to vector<8xf32>
    %49 = vector.shape_cast %48 : vector<8xf32> to vector<8x1xf32>
    %cst_26 = arith.constant 3.200000e+01 : f32
    %50 = vector.broadcast %cst_26 : f32 to vector<8x1xf32>
    %51 = arith.divf %49, %50 : vector<8x1xf32>
    %52 = vector.broadcast %44 : vector<8x1xf32> to vector<8x32xf32>
    %53 = arith.subf %30, %52 : vector<8x32xf32>
    %cst_27 = arith.constant 9.99999974E-6 : f32
    %54 = vector.broadcast %cst_27 : f32 to vector<8x1xf32>
    %55 = arith.addf %51, %54 : vector<8x1xf32>
    %56 = math.rsqrt %55 : vector<8x1xf32>
    %57 = vector.broadcast %56 : vector<8x1xf32> to vector<8x32xf32>
    %58 = arith.mulf %53, %57 : vector<8x32xf32>
    %59 = vector.broadcast %38 : vector<1x32xf32> to vector<8x32xf32>
    %60 = arith.mulf %58, %59 : vector<8x32xf32>
    %61 = vector.broadcast %40 : vector<1x32xf32> to vector<8x32xf32>
    %62 = arith.addf %60, %61 : vector<8x32xf32>
    %c0_28 = arith.constant 0 : index
    %c0_29 = arith.constant 0 : index
    %c0_30 = arith.constant 0 : index
    %63 = vector.load %arg8[%c0_28, %c0_29, %c0_30] : memref<2x32x96xbf16, #tpu.memory_space<vmem>>, vector<1x32x96xbf16>
    %64 = vector.shape_cast %63 : vector<1x32x96xbf16> to vector<32x96xbf16>
    %65 = arith.truncf %62 : vector<8x32xf32> to vector<8x32xbf16>
    %cst_31 = arith.constant dense<0.000000e+00> : vector<8x96xf32>
    %66 = tpu.matmul %65, %64, %cst_31 {dimension_numbers = #tpu.dot_dimension_numbers<[1], [0], [0], [1], [0, 0, 1, 1], [], []>} : vector<8x32xbf16>, vector<32x96xbf16>, vector<8x96xf32> -> vector<8x96xf32>
    %c0_32 = arith.constant 0 : index
    %c0_33 = arith.constant 0 : index
    %c0_34 = arith.constant 0 : index
    %67 = vector.load %arg9[%c0_32, %c0_33, %c0_34] : memref<2x1x96xf32, #tpu.memory_space<vmem>>, vector<1x1x96xf32>
    %68 = vector.shape_cast %67 : vector<1x1x96xf32> to vector<1x96xf32>
    %69 = vector.broadcast %68 : vector<1x96xf32> to vector<8x96xf32>
    %70 = arith.addf %66, %69 : vector<8x96xf32>
    %71 = vector.extract_strided_slice %70 {offsets = [0, 0], sizes = [8, 32], strides = [1, 1]} : vector<8x96xf32> to vector<8x32xf32>
    %cst_35 = arith.constant 0.353553385 : f32
    %72 = vector.broadcast %cst_35 : f32 to vector<8x32xf32>
    %73 = arith.mulf %71, %72 : vector<8x32xf32>
    %74 = vector.extract_strided_slice %70 {offsets = [0, 32], sizes = [8, 32], strides = [1, 1]} : vector<8x96xf32> to vector<8x32xf32>
    %75 = vector.extract_strided_slice %70 {offsets = [0, 64], sizes = [8, 32], strides = [1, 1]} : vector<8x96xf32> to vector<8x32xf32>
    %76 = vector.extract_strided_slice %73 {offsets = [0, 0], sizes = [8, 8], strides = [1, 1]} : vector<8x32xf32> to vector<8x8xf32>
    %77 = vector.extract_strided_slice %74 {offsets = [0, 0], sizes = [8, 8], strides = [1, 1]} : vector<8x32xf32> to vector<8x8xf32>
    %78 = arith.truncf %76 : vector<8x8xf32> to vector<8x8xbf16>
    %79 = arith.truncf %77 : vector<8x8xf32> to vector<8x8xbf16>
    %cst_36 = arith.constant dense<0.000000e+00> : vector<8x8xf32>
    %80 = tpu.matmul %78, %79, %cst_36 {dimension_numbers = #tpu.dot_dimension_numbers<[1], [1], [0], [0], [0, 0, 1, 0], [], []>} : vector<8x8xbf16>, vector<8x8xbf16>, vector<8x8xf32> -> vector<8x8xf32>
    %81 = vector.extract_strided_slice %73 {offsets = [0, 8], sizes = [8, 8], strides = [1, 1]} : vector<8x32xf32> to vector<8x8xf32>
    %82 = vector.extract_strided_slice %74 {offsets = [0, 8], sizes = [8, 8], strides = [1, 1]} : vector<8x32xf32> to vector<8x8xf32>
    %83 = arith.truncf %81 : vector<8x8xf32> to vector<8x8xbf16>
    %84 = arith.truncf %82 : vector<8x8xf32> to vector<8x8xbf16>
    %cst_37 = arith.constant dense<0.000000e+00> : vector<8x8xf32>
    %85 = tpu.matmul %83, %84, %cst_37 {dimension_numbers = #tpu.dot_dimension_numbers<[1], [1], [0], [0], [0, 0, 1, 0], [], []>} : vector<8x8xbf16>, vector<8x8xbf16>, vector<8x8xf32> -> vector<8x8xf32>
    %86 = vector.extract_strided_slice %73 {offsets = [0, 16], sizes = [8, 8], strides = [1, 1]} : vector<8x32xf32> to vector<8x8xf32>
    %87 = vector.extract_strided_slice %74 {offsets = [0, 16], sizes = [8, 8], strides = [1, 1]} : vector<8x32xf32> to vector<8x8xf32>
    %88 = arith.truncf %86 : vector<8x8xf32> to vector<8x8xbf16>
    %89 = arith.truncf %87 : vector<8x8xf32> to vector<8x8xbf16>
    %cst_38 = arith.constant dense<0.000000e+00> : vector<8x8xf32>
    %90 = tpu.matmul %88, %89, %cst_38 {dimension_numbers = #tpu.dot_dimension_numbers<[1], [1], [0], [0], [0, 0, 1, 0], [], []>} : vector<8x8xbf16>, vector<8x8xbf16>, vector<8x8xf32> -> vector<8x8xf32>
    %91 = vector.extract_strided_slice %73 {offsets = [0, 24], sizes = [8, 8], strides = [1, 1]} : vector<8x32xf32> to vector<8x8xf32>
    %92 = vector.extract_strided_slice %74 {offsets = [0, 24], sizes = [8, 8], strides = [1, 1]} : vector<8x32xf32> to vector<8x8xf32>
    %93 = arith.truncf %91 : vector<8x8xf32> to vector<8x8xbf16>
    %94 = arith.truncf %92 : vector<8x8xf32> to vector<8x8xbf16>
    %cst_39 = arith.constant dense<0.000000e+00> : vector<8x8xf32>
    %95 = tpu.matmul %93, %94, %cst_39 {dimension_numbers = #tpu.dot_dimension_numbers<[1], [1], [0], [0], [0, 0, 1, 0], [], []>} : vector<8x8xbf16>, vector<8x8xbf16>, vector<8x8xf32> -> vector<8x8xf32>
    %96 = tpu.concatenate %80, %85, %90, %95 in 0 : vector<8x8xf32>, vector<8x8xf32>, vector<8x8xf32>, vector<8x8xf32> -> vector<32x8xf32>
    %97 = vector.broadcast %36 : vector<1x8xf32> to vector<32x8xf32>
    %98 = arith.addf %96, %97 : vector<32x8xf32>
    %cst_40 = arith.constant dense<0xFF800000> : vector<32xf32>
    %99 = vector.multi_reduction <maximumf>, %98, %cst_40 [1] : vector<32x8xf32> to vector<32xf32>
    %100 = vector.shape_cast %99 : vector<32xf32> to vector<32x1xf32>
    %101 = vector.broadcast %100 : vector<32x1xf32> to vector<32x8xf32>
    %102 = arith.subf %98, %101 : vector<32x8xf32>
    %103 = math.exp %102 : vector<32x8xf32>
    %cst_41 = arith.constant dense<0.000000e+00> : vector<32xf32>
    %104 = vector.multi_reduction <add>, %103, %cst_41 [1] : vector<32x8xf32> to vector<32xf32>
    %105 = vector.shape_cast %104 : vector<32xf32> to vector<32x1xf32>
    %106 = tpu.reciprocal %105 {approx = true} : vector<32x1xf32> -> vector<32x1xf32>
    %107 = vector.broadcast %106 : vector<32x1xf32> to vector<32x8xf32>
    %108 = arith.mulf %103, %107 : vector<32x8xf32>
    %109 = vector.extract_strided_slice %108 {offsets = [0, 0], sizes = [8, 8], strides = [1, 1]} : vector<32x8xf32> to vector<8x8xf32>
    %110 = vector.extract_strided_slice %75 {offsets = [0, 0], sizes = [8, 8], strides = [1, 1]} : vector<8x32xf32> to vector<8x8xf32>
    %111 = arith.truncf %109 : vector<8x8xf32> to vector<8x8xbf16>
    %112 = arith.truncf %110 : vector<8x8xf32> to vector<8x8xbf16>
    %cst_42 = arith.constant dense<0.000000e+00> : vector<8x8xf32>
    %113 = tpu.matmul %111, %112, %cst_42 {dimension_numbers = #tpu.dot_dimension_numbers<[1], [0], [0], [1], [0, 0, 1, 1], [], []>} : vector<8x8xbf16>, vector<8x8xbf16>, vector<8x8xf32> -> vector<8x8xf32>
    %114 = vector.extract_strided_slice %108 {offsets = [8, 0], sizes = [8, 8], strides = [1, 1]} : vector<32x8xf32> to vector<8x8xf32>
    %115 = vector.extract_strided_slice %75 {offsets = [0, 8], sizes = [8, 8], strides = [1, 1]} : vector<8x32xf32> to vector<8x8xf32>
    %116 = arith.truncf %114 : vector<8x8xf32> to vector<8x8xbf16>
    %117 = arith.truncf %115 : vector<8x8xf32> to vector<8x8xbf16>
    %cst_43 = arith.constant dense<0.000000e+00> : vector<8x8xf32>
    %118 = tpu.matmul %116, %117, %cst_43 {dimension_numbers = #tpu.dot_dimension_numbers<[1], [0], [0], [1], [0, 0, 1, 1], [], []>} : vector<8x8xbf16>, vector<8x8xbf16>, vector<8x8xf32> -> vector<8x8xf32>
    %119 = vector.extract_strided_slice %108 {offsets = [16, 0], sizes = [8, 8], strides = [1, 1]} : vector<32x8xf32> to vector<8x8xf32>
    %120 = vector.extract_strided_slice %75 {offsets = [0, 16], sizes = [8, 8], strides = [1, 1]} : vector<8x32xf32> to vector<8x8xf32>
    %121 = arith.truncf %119 : vector<8x8xf32> to vector<8x8xbf16>
    %122 = arith.truncf %120 : vector<8x8xf32> to vector<8x8xbf16>
    %cst_44 = arith.constant dense<0.000000e+00> : vector<8x8xf32>
    %123 = tpu.matmul %121, %122, %cst_44 {dimension_numbers = #tpu.dot_dimension_numbers<[1], [0], [0], [1], [0, 0, 1, 1], [], []>} : vector<8x8xbf16>, vector<8x8xbf16>, vector<8x8xf32> -> vector<8x8xf32>
    %124 = vector.extract_strided_slice %108 {offsets = [24, 0], sizes = [8, 8], strides = [1, 1]} : vector<32x8xf32> to vector<8x8xf32>
    %125 = vector.extract_strided_slice %75 {offsets = [0, 24], sizes = [8, 8], strides = [1, 1]} : vector<8x32xf32> to vector<8x8xf32>
    %126 = arith.truncf %124 : vector<8x8xf32> to vector<8x8xbf16>
    %127 = arith.truncf %125 : vector<8x8xf32> to vector<8x8xbf16>
    %cst_45 = arith.constant dense<0.000000e+00> : vector<8x8xf32>
    %128 = tpu.matmul %126, %127, %cst_45 {dimension_numbers = #tpu.dot_dimension_numbers<[1], [0], [0], [1], [0, 0, 1, 1], [], []>} : vector<8x8xbf16>, vector<8x8xbf16>, vector<8x8xf32> -> vector<8x8xf32>
    %129 = tpu.concatenate %113, %118, %123, %128 in 1 : vector<8x8xf32>, vector<8x8xf32>, vector<8x8xf32>, vector<8x8xf32> -> vector<8x32xf32>
    %c0_46 = arith.constant 0 : index
    %c0_47 = arith.constant 0 : index
    %c0_48 = arith.constant 0 : index
    %130 = vector.load %arg10[%c0_46, %c0_47, %c0_48] : memref<2x32x32xbf16, #tpu.memory_space<vmem>>, vector<1x32x32xbf16>
    %131 = vector.shape_cast %130 : vector<1x32x32xbf16> to vector<32x32xbf16>
    %132 = arith.truncf %129 : vector<8x32xf32> to vector<8x32xbf16>
    %cst_49 = arith.constant dense<0.000000e+00> : vector<8x32xf32>
    %133 = tpu.matmul %132, %131, %cst_49 {dimension_numbers = #tpu.dot_dimension_numbers<[1], [0], [0], [1], [0, 0, 1, 1], [], []>} : vector<8x32xbf16>, vector<32x32xbf16>, vector<8x32xf32> -> vector<8x32xf32>
    %134 = arith.addf %30, %133 : vector<8x32xf32>
    %c0_50 = arith.constant 0 : index
    %c0_51 = arith.constant 0 : index
    %c0_52 = arith.constant 0 : index
    %135 = vector.load %arg11[%c0_50, %c0_51, %c0_52] : memref<2x1x32xf32, #tpu.memory_space<vmem>>, vector<1x1x32xf32>
    %136 = vector.shape_cast %135 : vector<1x1x32xf32> to vector<1x32xf32>
    %137 = vector.broadcast %136 : vector<1x32xf32> to vector<8x32xf32>
    %138 = arith.addf %134, %137 : vector<8x32xf32>
    %c0_53 = arith.constant 0 : index
    %c0_54 = arith.constant 0 : index
    %c0_55 = arith.constant 0 : index
    %139 = vector.load %arg12[%c0_53, %c0_54, %c0_55] : memref<2x1x32xf32, #tpu.memory_space<vmem>>, vector<1x1x32xf32>
    %140 = vector.shape_cast %139 : vector<1x1x32xf32> to vector<1x32xf32>
    %c0_56 = arith.constant 0 : index
    %c0_57 = arith.constant 0 : index
    %c0_58 = arith.constant 0 : index
    %141 = vector.load %arg13[%c0_56, %c0_57, %c0_58] : memref<2x1x32xf32, #tpu.memory_space<vmem>>, vector<1x1x32xf32>
    %142 = vector.shape_cast %141 : vector<1x1x32xf32> to vector<1x32xf32>
    %cst_59 = arith.constant dense<0.000000e+00> : vector<8xf32>
    %143 = vector.multi_reduction <add>, %138, %cst_59 [1] : vector<8x32xf32> to vector<8xf32>
    %144 = vector.shape_cast %143 : vector<8xf32> to vector<8x1xf32>
    %cst_60 = arith.constant 3.200000e+01 : f32
    %145 = vector.broadcast %cst_60 : f32 to vector<8x1xf32>
    %146 = arith.divf %144, %145 : vector<8x1xf32>
    %147 = vector.broadcast %146 : vector<8x1xf32> to vector<8x32xf32>
    %148 = arith.subf %138, %147 : vector<8x32xf32>
    %149 = arith.mulf %148, %148 : vector<8x32xf32>
    %cst_61 = arith.constant dense<0.000000e+00> : vector<8xf32>
    %150 = vector.multi_reduction <add>, %149, %cst_61 [1] : vector<8x32xf32> to vector<8xf32>
    %151 = vector.shape_cast %150 : vector<8xf32> to vector<8x1xf32>
    %cst_62 = arith.constant 3.200000e+01 : f32
    %152 = vector.broadcast %cst_62 : f32 to vector<8x1xf32>
    %153 = arith.divf %151, %152 : vector<8x1xf32>
    %154 = vector.broadcast %146 : vector<8x1xf32> to vector<8x32xf32>
    %155 = arith.subf %138, %154 : vector<8x32xf32>
    %cst_63 = arith.constant 9.99999974E-6 : f32
    %156 = vector.broadcast %cst_63 : f32 to vector<8x1xf32>
    %157 = arith.addf %153, %156 : vector<8x1xf32>
    %158 = math.rsqrt %157 : vector<8x1xf32>
    %159 = vector.broadcast %158 : vector<8x1xf32> to vector<8x32xf32>
    %160 = arith.mulf %155, %159 : vector<8x32xf32>
    %161 = vector.broadcast %140 : vector<1x32xf32> to vector<8x32xf32>
    %162 = arith.mulf %160, %161 : vector<8x32xf32>
    %163 = vector.broadcast %142 : vector<1x32xf32> to vector<8x32xf32>
    %164 = arith.addf %162, %163 : vector<8x32xf32>
    %c0_64 = arith.constant 0 : index
    %c0_65 = arith.constant 0 : index
    %c0_66 = arith.constant 0 : index
    %165 = vector.load %arg14[%c0_64, %c0_65, %c0_66] : memref<2x32x128xbf16, #tpu.memory_space<vmem>>, vector<1x32x128xbf16>
    %166 = vector.shape_cast %165 : vector<1x32x128xbf16> to vector<32x128xbf16>
    %167 = arith.truncf %164 : vector<8x32xf32> to vector<8x32xbf16>
    %cst_67 = arith.constant dense<0.000000e+00> : vector<8x128xf32>
    %168 = tpu.matmul %167, %166, %cst_67 {dimension_numbers = #tpu.dot_dimension_numbers<[1], [0], [0], [1], [0, 0, 1, 1], [], []>} : vector<8x32xbf16>, vector<32x128xbf16>, vector<8x128xf32> -> vector<8x128xf32>
    %c0_68 = arith.constant 0 : index
    %c0_69 = arith.constant 0 : index
    %c0_70 = arith.constant 0 : index
    %169 = vector.load %arg15[%c0_68, %c0_69, %c0_70] : memref<2x1x128xf32, #tpu.memory_space<vmem>>, vector<1x1x128xf32>
    %170 = vector.shape_cast %169 : vector<1x1x128xf32> to vector<1x128xf32>
    %171 = vector.broadcast %170 : vector<1x128xf32> to vector<8x128xf32>
    %172 = arith.addf %168, %171 : vector<8x128xf32>
    %cst_71 = arith.constant 1.702000e+00 : f32
    %173 = vector.broadcast %cst_71 : f32 to vector<8x128xf32>
    %174 = arith.mulf %173, %172 : vector<8x128xf32>
    %175 = arith.negf %174 : vector<8x128xf32>
    %176 = math.exp %175 : vector<8x128xf32>
    %cst_72 = arith.constant 1.000000e+00 : f32
    %177 = vector.broadcast %cst_72 : f32 to vector<8x128xf32>
    %178 = arith.addf %177, %176 : vector<8x128xf32>
    %179 = arith.divf %177, %178 : vector<8x128xf32>
    %180 = arith.mulf %172, %179 : vector<8x128xf32>
    %c0_73 = arith.constant 0 : index
    %c0_74 = arith.constant 0 : index
    %c0_75 = arith.constant 0 : index
    %181 = vector.load %arg16[%c0_73, %c0_74, %c0_75] : memref<2x128x32xbf16, #tpu.memory_space<vmem>>, vector<1x128x32xbf16>
    %182 = vector.shape_cast %181 : vector<1x128x32xbf16> to vector<128x32xbf16>
    %183 = arith.truncf %180 : vector<8x128xf32> to vector<8x128xbf16>
    %cst_76 = arith.constant dense<0.000000e+00> : vector<8x32xf32>
    %184 = tpu.matmul %183, %182, %cst_76 {dimension_numbers = #tpu.dot_dimension_numbers<[1], [0], [0], [1], [0, 0, 1, 1], [], []>} : vector<8x128xbf16>, vector<128x32xbf16>, vector<8x32xf32> -> vector<8x32xf32>
    %185 = arith.addf %138, %184 : vector<8x32xf32>
    %c0_77 = arith.constant 0 : index
    %c0_78 = arith.constant 0 : index
    %c0_79 = arith.constant 0 : index
    %186 = vector.load %arg17[%c0_77, %c0_78, %c0_79] : memref<2x1x32xf32, #tpu.memory_space<vmem>>, vector<1x1x32xf32>
    %187 = vector.shape_cast %186 : vector<1x1x32xf32> to vector<1x32xf32>
    %188 = vector.broadcast %187 : vector<1x32xf32> to vector<8x32xf32>
    %189 = arith.addf %185, %188 : vector<8x32xf32>
    %c1 = arith.constant 1 : index
    %c0_80 = arith.constant 0 : index
    %c0_81 = arith.constant 0 : index
    %190 = vector.load %arg6[%c1, %c0_80, %c0_81] : memref<2x1x32xf32, #tpu.memory_space<vmem>>, vector<1x1x32xf32>
    %191 = vector.shape_cast %190 : vector<1x1x32xf32> to vector<1x32xf32>
    %c1_82 = arith.constant 1 : index
    %c0_83 = arith.constant 0 : index
    %c0_84 = arith.constant 0 : index
    %192 = vector.load %arg7[%c1_82, %c0_83, %c0_84] : memref<2x1x32xf32, #tpu.memory_space<vmem>>, vector<1x1x32xf32>
    %193 = vector.shape_cast %192 : vector<1x1x32xf32> to vector<1x32xf32>
    %cst_85 = arith.constant dense<0.000000e+00> : vector<8xf32>
    %194 = vector.multi_reduction <add>, %189, %cst_85 [1] : vector<8x32xf32> to vector<8xf32>
    %195 = vector.shape_cast %194 : vector<8xf32> to vector<8x1xf32>
    %cst_86 = arith.constant 3.200000e+01 : f32
    %196 = vector.broadcast %cst_86 : f32 to vector<8x1xf32>
    %197 = arith.divf %195, %196 : vector<8x1xf32>
    %198 = vector.broadcast %197 : vector<8x1xf32> to vector<8x32xf32>
    %199 = arith.subf %189, %198 : vector<8x32xf32>
    %200 = arith.mulf %199, %199 : vector<8x32xf32>
    %cst_87 = arith.constant dense<0.000000e+00> : vector<8xf32>
    %201 = vector.multi_reduction <add>, %200, %cst_87 [1] : vector<8x32xf32> to vector<8xf32>
    %202 = vector.shape_cast %201 : vector<8xf32> to vector<8x1xf32>
    %cst_88 = arith.constant 3.200000e+01 : f32
    %203 = vector.broadcast %cst_88 : f32 to vector<8x1xf32>
    %204 = arith.divf %202, %203 : vector<8x1xf32>
    %205 = vector.broadcast %197 : vector<8x1xf32> to vector<8x32xf32>
    %206 = arith.subf %189, %205 : vector<8x32xf32>
    %cst_89 = arith.constant 9.99999974E-6 : f32
    %207 = vector.broadcast %cst_89 : f32 to vector<8x1xf32>
    %208 = arith.addf %204, %207 : vector<8x1xf32>
    %209 = math.rsqrt %208 : vector<8x1xf32>
    %210 = vector.broadcast %209 : vector<8x1xf32> to vector<8x32xf32>
    %211 = arith.mulf %206, %210 : vector<8x32xf32>
    %212 = vector.broadcast %191 : vector<1x32xf32> to vector<8x32xf32>
    %213 = arith.mulf %211, %212 : vector<8x32xf32>
    %214 = vector.broadcast %193 : vector<1x32xf32> to vector<8x32xf32>
    %215 = arith.addf %213, %214 : vector<8x32xf32>
    %c1_90 = arith.constant 1 : index
    %c0_91 = arith.constant 0 : index
    %c0_92 = arith.constant 0 : index
    %216 = vector.load %arg8[%c1_90, %c0_91, %c0_92] : memref<2x32x96xbf16, #tpu.memory_space<vmem>>, vector<1x32x96xbf16>
    %217 = vector.shape_cast %216 : vector<1x32x96xbf16> to vector<32x96xbf16>
    %218 = arith.truncf %215 : vector<8x32xf32> to vector<8x32xbf16>
    %cst_93 = arith.constant dense<0.000000e+00> : vector<8x96xf32>
    %219 = tpu.matmul %218, %217, %cst_93 {dimension_numbers = #tpu.dot_dimension_numbers<[1], [0], [0], [1], [0, 0, 1, 1], [], []>} : vector<8x32xbf16>, vector<32x96xbf16>, vector<8x96xf32> -> vector<8x96xf32>
    %c1_94 = arith.constant 1 : index
    %c0_95 = arith.constant 0 : index
    %c0_96 = arith.constant 0 : index
    %220 = vector.load %arg9[%c1_94, %c0_95, %c0_96] : memref<2x1x96xf32, #tpu.memory_space<vmem>>, vector<1x1x96xf32>
    %221 = vector.shape_cast %220 : vector<1x1x96xf32> to vector<1x96xf32>
    %222 = vector.broadcast %221 : vector<1x96xf32> to vector<8x96xf32>
    %223 = arith.addf %219, %222 : vector<8x96xf32>
    %224 = vector.extract_strided_slice %223 {offsets = [0, 0], sizes = [8, 32], strides = [1, 1]} : vector<8x96xf32> to vector<8x32xf32>
    %cst_97 = arith.constant 0.353553385 : f32
    %225 = vector.broadcast %cst_97 : f32 to vector<8x32xf32>
    %226 = arith.mulf %224, %225 : vector<8x32xf32>
    %227 = vector.extract_strided_slice %223 {offsets = [0, 32], sizes = [8, 32], strides = [1, 1]} : vector<8x96xf32> to vector<8x32xf32>
    %228 = vector.extract_strided_slice %223 {offsets = [0, 64], sizes = [8, 32], strides = [1, 1]} : vector<8x96xf32> to vector<8x32xf32>
    %229 = vector.extract_strided_slice %226 {offsets = [0, 0], sizes = [8, 8], strides = [1, 1]} : vector<8x32xf32> to vector<8x8xf32>
    %230 = vector.extract_strided_slice %227 {offsets = [0, 0], sizes = [8, 8], strides = [1, 1]} : vector<8x32xf32> to vector<8x8xf32>
    %231 = arith.truncf %229 : vector<8x8xf32> to vector<8x8xbf16>
    %232 = arith.truncf %230 : vector<8x8xf32> to vector<8x8xbf16>
    %cst_98 = arith.constant dense<0.000000e+00> : vector<8x8xf32>
    %233 = tpu.matmul %231, %232, %cst_98 {dimension_numbers = #tpu.dot_dimension_numbers<[1], [1], [0], [0], [0, 0, 1, 0], [], []>} : vector<8x8xbf16>, vector<8x8xbf16>, vector<8x8xf32> -> vector<8x8xf32>
    %234 = vector.extract_strided_slice %226 {offsets = [0, 8], sizes = [8, 8], strides = [1, 1]} : vector<8x32xf32> to vector<8x8xf32>
    %235 = vector.extract_strided_slice %227 {offsets = [0, 8], sizes = [8, 8], strides = [1, 1]} : vector<8x32xf32> to vector<8x8xf32>
    %236 = arith.truncf %234 : vector<8x8xf32> to vector<8x8xbf16>
    %237 = arith.truncf %235 : vector<8x8xf32> to vector<8x8xbf16>
    %cst_99 = arith.constant dense<0.000000e+00> : vector<8x8xf32>
    %238 = tpu.matmul %236, %237, %cst_99 {dimension_numbers = #tpu.dot_dimension_numbers<[1], [1], [0], [0], [0, 0, 1, 0], [], []>} : vector<8x8xbf16>, vector<8x8xbf16>, vector<8x8xf32> -> vector<8x8xf32>
    %239 = vector.extract_strided_slice %226 {offsets = [0, 16], sizes = [8, 8], strides = [1, 1]} : vector<8x32xf32> to vector<8x8xf32>
    %240 = vector.extract_strided_slice %227 {offsets = [0, 16], sizes = [8, 8], strides = [1, 1]} : vector<8x32xf32> to vector<8x8xf32>
    %241 = arith.truncf %239 : vector<8x8xf32> to vector<8x8xbf16>
    %242 = arith.truncf %240 : vector<8x8xf32> to vector<8x8xbf16>
    %cst_100 = arith.constant dense<0.000000e+00> : vector<8x8xf32>
    %243 = tpu.matmul %241, %242, %cst_100 {dimension_numbers = #tpu.dot_dimension_numbers<[1], [1], [0], [0], [0, 0, 1, 0], [], []>} : vector<8x8xbf16>, vector<8x8xbf16>, vector<8x8xf32> -> vector<8x8xf32>
    %244 = vector.extract_strided_slice %226 {offsets = [0, 24], sizes = [8, 8], strides = [1, 1]} : vector<8x32xf32> to vector<8x8xf32>
    %245 = vector.extract_strided_slice %227 {offsets = [0, 24], sizes = [8, 8], strides = [1, 1]} : vector<8x32xf32> to vector<8x8xf32>
    %246 = arith.truncf %244 : vector<8x8xf32> to vector<8x8xbf16>
    %247 = arith.truncf %245 : vector<8x8xf32> to vector<8x8xbf16>
    %cst_101 = arith.constant dense<0.000000e+00> : vector<8x8xf32>
    %248 = tpu.matmul %246, %247, %cst_101 {dimension_numbers = #tpu.dot_dimension_numbers<[1], [1], [0], [0], [0, 0, 1, 0], [], []>} : vector<8x8xbf16>, vector<8x8xbf16>, vector<8x8xf32> -> vector<8x8xf32>
    %249 = tpu.concatenate %233, %238, %243, %248 in 0 : vector<8x8xf32>, vector<8x8xf32>, vector<8x8xf32>, vector<8x8xf32> -> vector<32x8xf32>
    %250 = vector.broadcast %36 : vector<1x8xf32> to vector<32x8xf32>
    %251 = arith.addf %249, %250 : vector<32x8xf32>
    %cst_102 = arith.constant dense<0xFF800000> : vector<32xf32>
    %252 = vector.multi_reduction <maximumf>, %251, %cst_102 [1] : vector<32x8xf32> to vector<32xf32>
    %253 = vector.shape_cast %252 : vector<32xf32> to vector<32x1xf32>
    %254 = vector.broadcast %253 : vector<32x1xf32> to vector<32x8xf32>
    %255 = arith.subf %251, %254 : vector<32x8xf32>
    %256 = math.exp %255 : vector<32x8xf32>
    %cst_103 = arith.constant dense<0.000000e+00> : vector<32xf32>
    %257 = vector.multi_reduction <add>, %256, %cst_103 [1] : vector<32x8xf32> to vector<32xf32>
    %258 = vector.shape_cast %257 : vector<32xf32> to vector<32x1xf32>
    %259 = tpu.reciprocal %258 {approx = true} : vector<32x1xf32> -> vector<32x1xf32>
    %260 = vector.broadcast %259 : vector<32x1xf32> to vector<32x8xf32>
    %261 = arith.mulf %256, %260 : vector<32x8xf32>
    %262 = vector.extract_strided_slice %261 {offsets = [0, 0], sizes = [8, 8], strides = [1, 1]} : vector<32x8xf32> to vector<8x8xf32>
    %263 = vector.extract_strided_slice %228 {offsets = [0, 0], sizes = [8, 8], strides = [1, 1]} : vector<8x32xf32> to vector<8x8xf32>
    %264 = arith.truncf %262 : vector<8x8xf32> to vector<8x8xbf16>
    %265 = arith.truncf %263 : vector<8x8xf32> to vector<8x8xbf16>
    %cst_104 = arith.constant dense<0.000000e+00> : vector<8x8xf32>
    %266 = tpu.matmul %264, %265, %cst_104 {dimension_numbers = #tpu.dot_dimension_numbers<[1], [0], [0], [1], [0, 0, 1, 1], [], []>} : vector<8x8xbf16>, vector<8x8xbf16>, vector<8x8xf32> -> vector<8x8xf32>
    %267 = vector.extract_strided_slice %261 {offsets = [8, 0], sizes = [8, 8], strides = [1, 1]} : vector<32x8xf32> to vector<8x8xf32>
    %268 = vector.extract_strided_slice %228 {offsets = [0, 8], sizes = [8, 8], strides = [1, 1]} : vector<8x32xf32> to vector<8x8xf32>
    %269 = arith.truncf %267 : vector<8x8xf32> to vector<8x8xbf16>
    %270 = arith.truncf %268 : vector<8x8xf32> to vector<8x8xbf16>
    %cst_105 = arith.constant dense<0.000000e+00> : vector<8x8xf32>
    %271 = tpu.matmul %269, %270, %cst_105 {dimension_numbers = #tpu.dot_dimension_numbers<[1], [0], [0], [1], [0, 0, 1, 1], [], []>} : vector<8x8xbf16>, vector<8x8xbf16>, vector<8x8xf32> -> vector<8x8xf32>
    %272 = vector.extract_strided_slice %261 {offsets = [16, 0], sizes = [8, 8], strides = [1, 1]} : vector<32x8xf32> to vector<8x8xf32>
    %273 = vector.extract_strided_slice %228 {offsets = [0, 16], sizes = [8, 8], strides = [1, 1]} : vector<8x32xf32> to vector<8x8xf32>
    %274 = arith.truncf %272 : vector<8x8xf32> to vector<8x8xbf16>
    %275 = arith.truncf %273 : vector<8x8xf32> to vector<8x8xbf16>
    %cst_106 = arith.constant dense<0.000000e+00> : vector<8x8xf32>
    %276 = tpu.matmul %274, %275, %cst_106 {dimension_numbers = #tpu.dot_dimension_numbers<[1], [0], [0], [1], [0, 0, 1, 1], [], []>} : vector<8x8xbf16>, vector<8x8xbf16>, vector<8x8xf32> -> vector<8x8xf32>
    %277 = vector.extract_strided_slice %261 {offsets = [24, 0], sizes = [8, 8], strides = [1, 1]} : vector<32x8xf32> to vector<8x8xf32>
    %278 = vector.extract_strided_slice %228 {offsets = [0, 24], sizes = [8, 8], strides = [1, 1]} : vector<8x32xf32> to vector<8x8xf32>
    %279 = arith.truncf %277 : vector<8x8xf32> to vector<8x8xbf16>
    %280 = arith.truncf %278 : vector<8x8xf32> to vector<8x8xbf16>
    %cst_107 = arith.constant dense<0.000000e+00> : vector<8x8xf32>
    %281 = tpu.matmul %279, %280, %cst_107 {dimension_numbers = #tpu.dot_dimension_numbers<[1], [0], [0], [1], [0, 0, 1, 1], [], []>} : vector<8x8xbf16>, vector<8x8xbf16>, vector<8x8xf32> -> vector<8x8xf32>
    %282 = tpu.concatenate %266, %271, %276, %281 in 1 : vector<8x8xf32>, vector<8x8xf32>, vector<8x8xf32>, vector<8x8xf32> -> vector<8x32xf32>
    %c1_108 = arith.constant 1 : index
    %c0_109 = arith.constant 0 : index
    %c0_110 = arith.constant 0 : index
    %283 = vector.load %arg10[%c1_108, %c0_109, %c0_110] : memref<2x32x32xbf16, #tpu.memory_space<vmem>>, vector<1x32x32xbf16>
    %284 = vector.shape_cast %283 : vector<1x32x32xbf16> to vector<32x32xbf16>
    %285 = arith.truncf %282 : vector<8x32xf32> to vector<8x32xbf16>
    %cst_111 = arith.constant dense<0.000000e+00> : vector<8x32xf32>
    %286 = tpu.matmul %285, %284, %cst_111 {dimension_numbers = #tpu.dot_dimension_numbers<[1], [0], [0], [1], [0, 0, 1, 1], [], []>} : vector<8x32xbf16>, vector<32x32xbf16>, vector<8x32xf32> -> vector<8x32xf32>
    %287 = arith.addf %189, %286 : vector<8x32xf32>
    %c1_112 = arith.constant 1 : index
    %c0_113 = arith.constant 0 : index
    %c0_114 = arith.constant 0 : index
    %288 = vector.load %arg11[%c1_112, %c0_113, %c0_114] : memref<2x1x32xf32, #tpu.memory_space<vmem>>, vector<1x1x32xf32>
    %289 = vector.shape_cast %288 : vector<1x1x32xf32> to vector<1x32xf32>
    %290 = vector.broadcast %289 : vector<1x32xf32> to vector<8x32xf32>
    %291 = arith.addf %287, %290 : vector<8x32xf32>
    %c1_115 = arith.constant 1 : index
    %c0_116 = arith.constant 0 : index
    %c0_117 = arith.constant 0 : index
    %292 = vector.load %arg12[%c1_115, %c0_116, %c0_117] : memref<2x1x32xf32, #tpu.memory_space<vmem>>, vector<1x1x32xf32>
    %293 = vector.shape_cast %292 : vector<1x1x32xf32> to vector<1x32xf32>
    %c1_118 = arith.constant 1 : index
    %c0_119 = arith.constant 0 : index
    %c0_120 = arith.constant 0 : index
    %294 = vector.load %arg13[%c1_118, %c0_119, %c0_120] : memref<2x1x32xf32, #tpu.memory_space<vmem>>, vector<1x1x32xf32>
    %295 = vector.shape_cast %294 : vector<1x1x32xf32> to vector<1x32xf32>
    %cst_121 = arith.constant dense<0.000000e+00> : vector<8xf32>
    %296 = vector.multi_reduction <add>, %291, %cst_121 [1] : vector<8x32xf32> to vector<8xf32>
    %297 = vector.shape_cast %296 : vector<8xf32> to vector<8x1xf32>
    %cst_122 = arith.constant 3.200000e+01 : f32
    %298 = vector.broadcast %cst_122 : f32 to vector<8x1xf32>
    %299 = arith.divf %297, %298 : vector<8x1xf32>
    %300 = vector.broadcast %299 : vector<8x1xf32> to vector<8x32xf32>
    %301 = arith.subf %291, %300 : vector<8x32xf32>
    %302 = arith.mulf %301, %301 : vector<8x32xf32>
    %cst_123 = arith.constant dense<0.000000e+00> : vector<8xf32>
    %303 = vector.multi_reduction <add>, %302, %cst_123 [1] : vector<8x32xf32> to vector<8xf32>
    %304 = vector.shape_cast %303 : vector<8xf32> to vector<8x1xf32>
    %cst_124 = arith.constant 3.200000e+01 : f32
    %305 = vector.broadcast %cst_124 : f32 to vector<8x1xf32>
    %306 = arith.divf %304, %305 : vector<8x1xf32>
    %307 = vector.broadcast %299 : vector<8x1xf32> to vector<8x32xf32>
    %308 = arith.subf %291, %307 : vector<8x32xf32>
    %cst_125 = arith.constant 9.99999974E-6 : f32
    %309 = vector.broadcast %cst_125 : f32 to vector<8x1xf32>
    %310 = arith.addf %306, %309 : vector<8x1xf32>
    %311 = math.rsqrt %310 : vector<8x1xf32>
    %312 = vector.broadcast %311 : vector<8x1xf32> to vector<8x32xf32>
    %313 = arith.mulf %308, %312 : vector<8x32xf32>
    %314 = vector.broadcast %293 : vector<1x32xf32> to vector<8x32xf32>
    %315 = arith.mulf %313, %314 : vector<8x32xf32>
    %316 = vector.broadcast %295 : vector<1x32xf32> to vector<8x32xf32>
    %317 = arith.addf %315, %316 : vector<8x32xf32>
    %c1_126 = arith.constant 1 : index
    %c0_127 = arith.constant 0 : index
    %c0_128 = arith.constant 0 : index
    %318 = vector.load %arg14[%c1_126, %c0_127, %c0_128] : memref<2x32x128xbf16, #tpu.memory_space<vmem>>, vector<1x32x128xbf16>
    %319 = vector.shape_cast %318 : vector<1x32x128xbf16> to vector<32x128xbf16>
    %320 = arith.truncf %317 : vector<8x32xf32> to vector<8x32xbf16>
    %cst_129 = arith.constant dense<0.000000e+00> : vector<8x128xf32>
    %321 = tpu.matmul %320, %319, %cst_129 {dimension_numbers = #tpu.dot_dimension_numbers<[1], [0], [0], [1], [0, 0, 1, 1], [], []>} : vector<8x32xbf16>, vector<32x128xbf16>, vector<8x128xf32> -> vector<8x128xf32>
    %c1_130 = arith.constant 1 : index
    %c0_131 = arith.constant 0 : index
    %c0_132 = arith.constant 0 : index
    %322 = vector.load %arg15[%c1_130, %c0_131, %c0_132] : memref<2x1x128xf32, #tpu.memory_space<vmem>>, vector<1x1x128xf32>
    %323 = vector.shape_cast %322 : vector<1x1x128xf32> to vector<1x128xf32>
    %324 = vector.broadcast %323 : vector<1x128xf32> to vector<8x128xf32>
    %325 = arith.addf %321, %324 : vector<8x128xf32>
    %cst_133 = arith.constant 1.702000e+00 : f32
    %326 = vector.broadcast %cst_133 : f32 to vector<8x128xf32>
    %327 = arith.mulf %326, %325 : vector<8x128xf32>
    %328 = arith.negf %327 : vector<8x128xf32>
    %329 = math.exp %328 : vector<8x128xf32>
    %cst_134 = arith.constant 1.000000e+00 : f32
    %330 = vector.broadcast %cst_134 : f32 to vector<8x128xf32>
    %331 = arith.addf %330, %329 : vector<8x128xf32>
    %332 = arith.divf %330, %331 : vector<8x128xf32>
    %333 = arith.mulf %325, %332 : vector<8x128xf32>
    %c1_135 = arith.constant 1 : index
    %c0_136 = arith.constant 0 : index
    %c0_137 = arith.constant 0 : index
    %334 = vector.load %arg16[%c1_135, %c0_136, %c0_137] : memref<2x128x32xbf16, #tpu.memory_space<vmem>>, vector<1x128x32xbf16>
    %335 = vector.shape_cast %334 : vector<1x128x32xbf16> to vector<128x32xbf16>
    %336 = arith.truncf %333 : vector<8x128xf32> to vector<8x128xbf16>
    %cst_138 = arith.constant dense<0.000000e+00> : vector<8x32xf32>
    %337 = tpu.matmul %336, %335, %cst_138 {dimension_numbers = #tpu.dot_dimension_numbers<[1], [0], [0], [1], [0, 0, 1, 1], [], []>} : vector<8x128xbf16>, vector<128x32xbf16>, vector<8x32xf32> -> vector<8x32xf32>
    %338 = arith.addf %291, %337 : vector<8x32xf32>
    %c1_139 = arith.constant 1 : index
    %c0_140 = arith.constant 0 : index
    %c0_141 = arith.constant 0 : index
    %339 = vector.load %arg17[%c1_139, %c0_140, %c0_141] : memref<2x1x32xf32, #tpu.memory_space<vmem>>, vector<1x1x32xf32>
    %340 = vector.shape_cast %339 : vector<1x1x32xf32> to vector<1x32xf32>
    %341 = vector.broadcast %340 : vector<1x32xf32> to vector<8x32xf32>
    %342 = arith.addf %338, %341 : vector<8x32xf32>
    %343 = vector.extract_strided_slice %342 {offsets = [0, 0], sizes = [1, 32], strides = [1, 1]} : vector<8x32xf32> to vector<1x32xf32>
    %c0_142 = arith.constant 0 : index
    %c0_143 = arith.constant 0 : index
    %344 = vector.load %arg18[%c0_142, %c0_143] : memref<1x32xf32, #tpu.memory_space<vmem>>, vector<1x32xf32>
    %c0_144 = arith.constant 0 : index
    %c0_145 = arith.constant 0 : index
    %345 = vector.load %arg19[%c0_144, %c0_145] : memref<1x32xf32, #tpu.memory_space<vmem>>, vector<1x32xf32>
    %cst_146 = arith.constant dense<0.000000e+00> : vector<1xf32>
    %346 = vector.multi_reduction <add>, %343, %cst_146 [1] : vector<1x32xf32> to vector<1xf32>
    %347 = vector.shape_cast %346 : vector<1xf32> to vector<1x1xf32>
    %cst_147 = arith.constant 3.200000e+01 : f32
    %348 = vector.broadcast %cst_147 : f32 to vector<1x1xf32>
    %349 = arith.divf %347, %348 : vector<1x1xf32>
    %350 = vector.broadcast %349 : vector<1x1xf32> to vector<1x32xf32>
    %351 = arith.subf %343, %350 : vector<1x32xf32>
    %352 = arith.mulf %351, %351 : vector<1x32xf32>
    %cst_148 = arith.constant dense<0.000000e+00> : vector<1xf32>
    %353 = vector.multi_reduction <add>, %352, %cst_148 [1] : vector<1x32xf32> to vector<1xf32>
    %354 = vector.shape_cast %353 : vector<1xf32> to vector<1x1xf32>
    %cst_149 = arith.constant 3.200000e+01 : f32
    %355 = vector.broadcast %cst_149 : f32 to vector<1x1xf32>
    %356 = arith.divf %354, %355 : vector<1x1xf32>
    %357 = vector.broadcast %349 : vector<1x1xf32> to vector<1x32xf32>
    %358 = arith.subf %343, %357 : vector<1x32xf32>
    %cst_150 = arith.constant 9.99999974E-6 : f32
    %359 = vector.broadcast %cst_150 : f32 to vector<1x1xf32>
    %360 = arith.addf %356, %359 : vector<1x1xf32>
    %361 = math.rsqrt %360 : vector<1x1xf32>
    %362 = vector.broadcast %361 : vector<1x1xf32> to vector<1x32xf32>
    %363 = arith.mulf %358, %362 : vector<1x32xf32>
    %364 = arith.mulf %363, %344 : vector<1x32xf32>
    %365 = arith.addf %364, %345 : vector<1x32xf32>
    %c0_151 = arith.constant 0 : index
    %c0_152 = arith.constant 0 : index
    %366 = vector.load %arg20[%c0_151, %c0_152] : memref<32x128xbf16, #tpu.memory_space<vmem>>, vector<32x128xbf16>
    %367 = arith.truncf %365 : vector<1x32xf32> to vector<1x32xbf16>
    %cst_153 = arith.constant dense<0.000000e+00> : vector<1x128xf32>
    %368 = tpu.matmul %367, %366, %cst_153 {dimension_numbers = #tpu.dot_dimension_numbers<[1], [0], [0], [1], [0, 0, 1, 1], [], []>} : vector<1x32xbf16>, vector<32x128xbf16>, vector<1x128xf32> -> vector<1x128xf32>
    %c0_154 = arith.constant 0 : index
    %c0_155 = arith.constant 0 : index
    %c0_156 = arith.constant 0 : index
    %369 = vector.load %arg21[%c0_154, %c0_155, %c0_156] : memref<1x1x128xf32, #tpu.memory_space<vmem>>, vector<1x1x128xf32>
    %370 = vector.shape_cast %369 : vector<1x1x128xf32> to vector<1x128xf32>
    %371 = vector.shape_cast %368 : vector<1x128xf32> to vector<1x1x128xf32>
    tpu.vector_store %arg21[%c0_154, %c0_155, %c0_156], %371 {strides = array<i32>} : memref<1x1x128xf32, #tpu.memory_space<vmem>>, vector<1x1x128xf32>,
    return
  }
  func.func @transform_0(%arg0: i32) -> (i32, i32, i32) {
    %c0_i32 = arith.constant 0 : i32
    %c0_i32_0 = arith.constant 0 : i32
    %c0_i32_1 = arith.constant 0 : i32
    return %arg0, %c0_i32, %c0_i32_0 : i32, i32, i32
  }
  func.func @transform_1(%arg0: i32) -> (i32, i32) {
    %c0_i32 = arith.constant 0 : i32
    %c0_i32_0 = arith.constant 0 : i32
    %c0_i32_1 = arith.constant 0 : i32
    return %c0_i32, %c0_i32_0 : i32, i32
  }
  func.func @transform_2(%arg0: i32) -> (i32, i32) {
    %c0_i32 = arith.constant 0 : i32
    %c0_i32_0 = arith.constant 0 : i32
    %c0_i32_1 = arith.constant 0 : i32
    return %c0_i32, %c0_i32_0 : i32, i32
  }
  func.func @transform_3(%arg0: i32) -> (i32, i32) {
    %c0_i32 = arith.constant 0 : i32
    %c0_i32_0 = arith.constant 0 : i32
    %c0_i32_1 = arith.constant 0 : i32
    return %c0_i32, %c0_i32_0 : i32, i32
  }
  func.func @transform_4(%arg0: i32) -> (i32, i32) {
    %c0_i32 = arith.constant 0 : i32
    %c0_i32_0 = arith.constant 0 : i32
    %c0_i32_1 = arith.constant 0 : i32
    return %c0_i32, %c0_i32_0 : i32, i32
  }
  func.func @transform_5(%arg0: i32) -> (i32, i32, i32) {
    %c0_i32 = arith.constant 0 : i32
    %c0_i32_0 = arith.constant 0 : i32
    %c0_i32_1 = arith.constant 0 : i32
    %c0_i32_2 = arith.constant 0 : i32
    return %c0_i32, %c0_i32_0, %c0_i32_1 : i32, i32, i32
  }
  func.func @transform_6(%arg0: i32) -> (i32, i32, i32) {
    %c0_i32 = arith.constant 0 : i32
    %c0_i32_0 = arith.constant 0 : i32
    %c0_i32_1 = arith.constant 0 : i32
    %c0_i32_2 = arith.constant 0 : i32
    return %c0_i32, %c0_i32_0, %c0_i32_1 : i32, i32, i32
  }
  func.func @transform_7(%arg0: i32) -> (i32, i32, i32) {
    %c0_i32 = arith.constant 0 : i32
    %c0_i32_0 = arith.constant 0 : i32
    %c0_i32_1 = arith.constant 0 : i32
    %c0_i32_2 = arith.constant 0 : i32
    return %c0_i32, %c0_i32_0, %c0_i32_1 : i32, i32, i32
  }
  func.func @transform_8(%arg0: i32) -> (i32, i32, i32) {
    %c0_i32 = arith.constant 0 : i32
    %c0_i32_0 = arith.constant 0 : i32
    %c0_i32_1 = arith.constant 0 : i32
    %c0_i32_2 = arith.constant 0 : i32
    return %c0_i32, %c0_i32_0, %c0_i32_1 : i32, i32, i32
  }
  func.func @transform_9(%arg0: i32) -> (i32, i32, i32) {
    %c0_i32 = arith.constant 0 : i32
    %c0_i32_0 = arith.constant 0 : i32
    %c0_i32_1 = arith.constant 0 : i32
    %c0_i32_2 = arith.constant 0 : i32
    return %c0_i32, %c0_i32_0, %c0_i32_1 : i32, i32, i32
  }
  func.func @transform_10(%arg0: i32) -> (i32, i32, i32) {
    %c0_i32 = arith.constant 0 : i32
    %c0_i32_0 = arith.constant 0 : i32
    %c0_i32_1 = arith.constant 0 : i32
    %c0_i32_2 = arith.constant 0 : i32
    return %c0_i32, %c0_i32_0, %c0_i32_1 : i32, i32, i32
  }
  func.func @transform_11(%arg0: i32) -> (i32, i32, i32) {
    %c0_i32 = arith.constant 0 : i32
    %c0_i32_0 = arith.constant 0 : i32
    %c0_i32_1 = arith.constant 0 : i32
    %c0_i32_2 = arith.constant 0 : i32
    return %c0_i32, %c0_i32_0, %c0_i32_1 : i32, i32, i32
  }
  func.func @transform_12(%arg0: i32) -> (i32, i32, i32) {
    %c0_i32 = arith.constant 0 : i32
    %c0_i32_0 = arith.constant 0 : i32
    %c0_i32_1 = arith.constant 0 : i32
    %c0_i32_2 = arith.constant 0 : i32
    return %c0_i32, %c0_i32_0, %c0_i32_1 : i32, i32, i32
  }
  func.func @transform_13(%arg0: i32) -> (i32, i32, i32) {
    %c0_i32 = arith.constant 0 : i32
    %c0_i32_0 = arith.constant 0 : i32
    %c0_i32_1 = arith.constant 0 : i32
    %c0_i32_2 = arith.constant 0 : i32
    return %c0_i32, %c0_i32_0, %c0_i32_1 : i32, i32, i32
  }
  func.func @transform_14(%arg0: i32) -> (i32, i32, i32) {
    %c0_i32 = arith.constant 0 : i32
    %c0_i32_0 = arith.constant 0 : i32
    %c0_i32_1 = arith.constant 0 : i32
    %c0_i32_2 = arith.constant 0 : i32
    return %c0_i32, %c0_i32_0, %c0_i32_1 : i32, i32, i32
  }
  func.func @transform_15(%arg0: i32) -> (i32, i32, i32) {
    %c0_i32 = arith.constant 0 : i32
    %c0_i32_0 = arith.constant 0 : i32
    %c0_i32_1 = arith.constant 0 : i32
    %c0_i32_2 = arith.constant 0 : i32
    return %c0_i32, %c0_i32_0, %c0_i32_1 : i32, i32, i32
  }
  func.func @transform_16(%arg0: i32) -> (i32, i32, i32) {
    %c0_i32 = arith.constant 0 : i32
    %c0_i32_0 = arith.constant 0 : i32
    %c0_i32_1 = arith.constant 0 : i32
    %c0_i32_2 = arith.constant 0 : i32
    return %c0_i32, %c0_i32_0, %c0_i32_1 : i32, i32, i32
  }
  func.func @transform_17(%arg0: i32) -> (i32, i32) {
    %c0_i32 = arith.constant 0 : i32
    %c0_i32_0 = arith.constant 0 : i32
    %c0_i32_1 = arith.constant 0 : i32
    return %c0_i32, %c0_i32_0 : i32, i32
  }
  func.func @transform_18(%arg0: i32) -> (i32, i32) {
    %c0_i32 = arith.constant 0 : i32
    %c0_i32_0 = arith.constant 0 : i32
    %c0_i32_1 = arith.constant 0 : i32
    return %c0_i32, %c0_i32_0 : i32, i32
  }
  func.func @transform_19(%arg0: i32) -> (i32, i32) {
    %c0_i32 = arith.constant 0 : i32
    %c0_i32_0 = arith.constant 0 : i32
    %c0_i32_1 = arith.constant 0 : i32
    return %c0_i32, %c0_i32_0 : i32, i32
  }
  func.func @transform_20(%arg0: i32) -> (i32, i32, i32) {
    %c0_i32 = arith.constant 0 : i32
    %c0_i32_0 = arith.constant 0 : i32
    %c0_i32_1 = arith.constant 0 : i32
    return %arg0, %c0_i32, %c0_i32_0 : i32, i32, i32
  }
}

</mosaic_0001>

<bundles_post_ra>
// kernel: encode_image.1
= control target key start
LH: loop header
LB: loop body
LE: loop exit
PB: predicated region body
PF: predicated region fallthrough
CT: control target
= control target key end

     0   :  { %s3933_s0 = inlined_call_operand.vmem [shape: f32[2,8,192], index: 0, kind: input, shape index: {}]   ;;  %s3934_s1 = inlined_call_operand.vmem [shape: bf16[192,32], index: 1, kind: input, shape index: {}]   ;;  %s3935_s2 = inlined_call_operand.vmem [shape: f32[8,32], index: 2, kind: input, shape index: {}]   ;;  %s3936_s3 = inlined_call_operand.vmem [shape: f32[1,32], index: 3, kind: input, shape index: {}]   ;;  %s3937_s4 = inlined_call_operand.vmem [shape: f32[1,32], index: 4, kind: input, shape index: {}]   ;;  %s3938_s5 = inlined_call_operand.vmem [shape: f32[2,1,32], index: 5, kind: input, shape index: {}]   ;;  %s3939_s6 = inlined_call_operand.vmem [shape: f32[2,1,32], index: 6, kind: input, shape index: {}]   ;;  %s3940_s7 = inlined_call_operand.vmem [shape: bf16[2,32,96], index: 7, kind: input, shape index: {}]   ;;  %s3941_s8 = inlined_call_operand.vmem [shape: f32[2,1,96], index: 8, kind: input, shape index: {}]   ;;  %s3942_s9 = inlined_call_operand.vmem [shape: bf16[2,32,32], index: 9, kind: input, shape index: {}]   ;;  %s3943_s10 = inlined_call_operand.vmem [shape: f32[2,1,32], index: 10, kind: input, shape index: {}]   ;;  %s3944_s11 = inlined_call_operand.vmem [shape: f32[2,1,32], index: 11, kind: input, shape index: {}]   ;;  %s3945_s12 = inlined_call_operand.vmem [shape: f32[2,1,32], index: 12, kind: input, shape index: {}]   ;;  %s3946_s13 = inlined_call_operand.vmem [shape: bf16[2,32,128], index: 13, kind: input, shape index: {}]   ;;  %s3947_s14 = inlined_call_operand.vmem [shape: f32[2,1,128], index: 14, kind: input, shape index: {}]   ;;  %s3948_s15 = inlined_call_operand.vmem [shape: bf16[2,128,32], index: 15, kind: input, shape index: {}]   ;;  %s3949_s16 = inlined_call_operand.vmem [shape: f32[2,1,32], index: 16, kind: input, shape index: {}]   ;;  %s3950_s17 = inlined_call_operand.vmem [shape: f32[1,32], index: 17, kind: input, shape index: {}]   ;;  %s3951_s18 = inlined_call_operand.vmem [shape: f32[1,32], index: 18, kind: input, shape index: {}]   ;;  %s3952_s19 = inlined_call_operand.vmem [shape: bf16[32,128], index: 19, kind: input, shape index: {}]   ;;  %s3953_s20 = inlined_call_operand.hbm [shape: f32[2,1,128], index: 20, kind: output, shape index: {}]  }
   0x1   :  { %3971 = sst [smem:[#allocation11_spill]] %s3933_s0 }
   0x2   :  { %3972 = sst [smem:[#allocation12_spill]] %s3934_s1 }
   0x3   :  { %3973 = sst [smem:[#allocation13_spill]] %s3935_s2 }
   0x4   :  { %3974 = sst [smem:[#allocation14_spill]] %s3936_s3 }
   0x5   :  { %3975 = sst [smem:[#allocation15_spill]] %s3937_s4 }
   0x6   :  { %3976 = sst [smem:[#allocation16_spill]] %s3953_s20 }
   0x7   :  { %25 = vsyncpa [#allocation3], 0 }
   0x8   :  { %27 = vsyncpa [#allocation3 + $0x1], 0  ;;  %s3395_s1 = smov 0   ;;  %s3397_s22 = smov 0  }
   0x9   :  { %s3399_s23 = smov 0   ;;  %s3401_s24 = smov 0  }
   0xa LB: > { %3977 = sst [smem:[#allocation5_spill]] %s3257_s1  ;;  %s3416_s2 = sadd.s32 4294967295, %s3269_s24   ;;  %s3269_s24 = sphi %s3401_s24, %s4003_s24   ;;  %s3265_s23 = sphi %s3399_s23, %s4005_s23   ;;  %s3261_s22 = sphi %s3397_s22, %s4007_s22   ;;  %s3257_s1 = sphi %s3395_s1, %s4006_s1  }
   0xb   : > { %3978 = sst [smem:[#allocation6_spill]] %s3265_s23  ;;  %s2661_s25 = sadd.s32 4294967294, %s3269_s24  }
   0xc   : > { %3979 = sst [smem:[#allocation7_spill]] %s3269_s24  ;;  %s3420_s3 = sadd.s32 1, %s3269_s24  }
   0xd   : > { %3980 = sst [smem:[#allocation8_spill]] %s3420_s3  ;;  %s465_s26 = sadd.s32 1, %s3265_s23 }
   0xe   : > { %s462_s27 = ssub.s32 %s3269_s24, %s3420_s3  ;;  %p475_p0 = scmp.ne.s32.totalorder %s3265_s23, %s3261_s22 }
   0xf   : > { %p463_p1 = scmp.eq.s32.totalorder %s462_s27, 0  ;;  %p476_p2 = scmp.eq.s32.totalorder %s3416_s2, 1 }
  0x10   : > { %p481_p3 = scmp.ne.s32.totalorder %s3261_s22, %s3257_s1  ;;  %p482_p4 = scmp.eq.s32.totalorder %s2661_s25, 1 }
  0x11   : > { %s3431_s28 = scalar_select %p463_p1, %s3265_s23, %s465_s26  }
  0x12   : > { %p3433_p5 = por %p476_p2, %p475_p0  ;;  %p3437_p6 = por %p482_p4, %p481_p3 }
  0x13   : > { %3981 = sst [smem:[#allocation9_spill]] %s3431_s28  ;;  %p2664_p7 = scmp.ge.s32.totalorder %s3269_s24, 1 }
  0x14   : > { %s3983_s29 = scalar_select %p3437_p6, 1, 0 }
  0x15   : > { %p565_p8 = scmp.lt.s32.totalorder %s3269_s24, 3 }
  0x16   : > { %3984 = sst [smem:[#allocation10_spill]] %s3983_s29 }
  0x17   : > { %p566_p9 = pnand %p2664_p7, %p565_p8 }
  0x18   : > { %s3985_s21 = sld [smem:[#allocation12_spill]] (!%p566_p9)  ;;  %v3271_v1 = vmov (!%p566_p9), 0   ;;  %p622_p10 = scmp.lt.s32.totalorder (!%p566_p9), %s3416_s2, 1  ;;  %vm729_vm0 = vcmask (!%p566_p9), 523264   ;;  %vm775_vm1 = vcmask (!%p566_p9), 261120   ;;  %v3125_v44 = vld [vmem:[%s3940_s7] sm:$0xff] (!%p566_p9)  }
  0x19   : > { %569 = sbr.rel (%p566_p9) target bundleno = 6241 (0x1861), region = 100  ;;  %733 = vmatprep.subr.bf16.mxu0 (!%p566_p9), %v3271_v1  ;;  %s3986_s29 = sld [smem:[#allocation11_spill]] (!%p566_p9)  ;;  %v3272_v45 = vmov (!%p566_p9), 0.0   ;;  %vm3273_vm2 = vmmov (!%p566_p9), 0   ;;  %v3126_v46 = vld [vmem:[%s3940_s7 + $0x8] sm:$0xff] (!%p566_p9)   ;;  %vm910_vm3 = vcmask (!%p566_p9), 64512  }
  0x1a   : > { %s3988_s30 = sld [smem:[#allocation14_spill]] (!%p566_p9)  ;;  %s3989_s26 = sld [smem:[#allocation15_spill]] (!%p566_p9)  ;;  %2864 = vmatprep.subr.bf16.mxu1 (!%p566_p9), %v3272_v45  ;;  %2868 = vmatprep.mubr.msk.bf16.mxu1 (!%p566_p9), %vm3273_vm2, %v3272_v45  ;;  %v2682_v51 = vld [vmem:[%s3938_s5] ss:$0 sm:$0xff] (!%p566_p9)  ;;  %vm1162_vm5 = vcmask (!%p566_p9), 1043456   ;;  %vm1366_vm6 = vcmask (!%p566_p9), 130048  }
  0x1b   : > { %2865 = vmatpush3.bf16.msra.mxu1 (!%p566_p9), %v3125_v44  ;;  %v2683_v53 = vld [vmem:[%s3939_s6] ss:$0 sm:$0xff] (!%p566_p9)  ;;  %s3274_s25 = smov (!%p566_p9), 88   ;;  %s3969_s23 = smov (!%p566_p9), 112   ;;  %vm1368_vm7 = vcmask (!%p566_p9), 195584   ;;  %vm2516_vm8 = vcmask (!%p566_p9), 253952  }
  0x1c   : > { %2866 = vmatprep.subr.bf16.mxu1 (!%p566_p9), %v3272_v45  ;;  %v2684_v57 = vld [vmem:[%s3941_s8] ss:$0 sm:$0xff] (!%p566_p9)  ;;  %s3278_s28 = smov (!%p566_p9), 104   ;;  %s3970_s20 = smov (!%p566_p9), 80  }
  0x1d   : > { %s3280_s24 = smov (!%p566_p9), 72   ;;  %s3966_s0 = smov (!%p566_p9), 16  }
  0x1e   : > { %v3113_v0 = vld [vmem:[%s3985_s21] sm:$0xff] (!%p566_p9)   ;;  %v3114_v2 = vld [vmem:[%s3985_s21 + $0x8] sm:$0xff] (!%p566_p9)   ;;  %v3115_v3 = vld [vmem:[%s3985_s21 + $0x10] sm:$0xff] (!%p566_p9)  }
  0x1f   : > { %734 = vmatpush1.bf16.msra.mxu0 (!%p566_p9), %v3113_v0  ;;  %v3116_v4 = vld [vmem:[%s3985_s21 + $0x18] sm:$0xff] (!%p566_p9)   ;;  %v3117_v5 = vld [vmem:[%s3985_s21 + $0x20] sm:$0xff] (!%p566_p9)   ;;  %v3118_v8 = vld [vmem:[%s3985_s21 + $0x28] sm:$0xff] (!%p566_p9)   ;;  %2867 = vmatpush3.bf16.msra.mxu1 (!%p566_p9), %v3126_v46 }
  0x20   : > { %735 = vmatprep.subr.bf16.mxu0 %v3271_v1  ;;  %s623_s27 = scalar_select %p622_p10, %s3416_s2, 1  ;;  %v3119_v9 = vld [vmem:[%s3985_s21 + $0x30] sm:$0xff]   ;;  %v3120_v10 = vld [vmem:[%s3985_s21 + $0x38] sm:$0xff]   ;;  %v3121_v11 = vld [vmem:[%s3985_s21 + $0x40] sm:$0xff]   ;;  %2872 = vmatprep.subr.bf16.mxu1 %v3272_v45 }
  0x21   : > { %v3122_v12 = vld [vmem:[%s3985_s21 + $0x48] sm:$0xff]   ;;  %v3123_v13 = vld [vmem:[%s3985_s21 + $0x50] sm:$0xff]   ;;  %v3124_v14 = vld [vmem:[%s3985_s21 + $0x58] sm:$0xff]  }
  0x22   : > { %s2792_s3 = sshll.u32 %s623_s27, 4  ;;  %v2680_v33 = vld [vmem:[%s3988_s30] ss:$0 sm:$0xff]  ;;  %s3962_s27 = smov 40  }
  0x23   : > { %736 = vmatpush1.bf16.msra.mxu0 %v3114_v2  ;;  %s3457_s1 = scalar_lea.vmem %s3986_s29, %s2792_s3  ;;  %s3987_s29 = sld [smem:[#allocation13_spill]]  ;;  %v2681_v35 = vld [vmem:[%s3989_s26] ss:$0 sm:$0xff] }
  0x24   : > { %737 = vmatprep.subr.bf16.mxu0 %v3271_v1  ;;  %v629_v6 = vld [vmem:[%s3457_s1 + $0x8] sm:$0xff]  ;;  %v628_v15 = vld [vmem:[%s3457_s1] sm:$0xff]  ;;  %s3275_s26 = smov 96   ;;  %s3277_s3 = smov 120  }
  0x25   : > { %v655_v7 = vpack.c.bf16 %v629_v6, %v629_v6  ;;  %v654_v16 = vpack.c.bf16 %v628_v15, %v628_v15  ;;  %v3281_v15 = vmov -1e+30   ;;  %s3964_s1 = smov 48   ;;  %s3963_s30 = smov 56  }
  0x27   : > { %738 = vmatpush1.bf16.msra.mxu0 %v3115_v3  ;;  %2679 = vmatprep.mubr.msk.bf16.mxu0 %vm729_vm0, %v655_v7 }
  0x28   : > { %739 = vmatprep.subr.bf16.mxu0 %v3271_v1 }
  0x29   : > { %v656_v17 = vld [vmem:[%s3987_s29] sm:$0xff]  ;;  %s3965_s29 = smov 64  }
  0x2b   : > { %740 = vmatpush1.bf16.msra.mxu0 %v3116_v4 }
  0x2c   : > { %741 = vmatprep.subr.bf16.mxu0 %v3271_v1 }
  0x2f   : > { %742 = vmatpush1.bf16.msra.mxu0 %v3117_v5 }
  0x30   : > { %743 = vmatprep.subr.bf16.mxu0 %v3271_v1 }
  0x33   : > { %744 = vmatpush1.bf16.msra.mxu0 %v3118_v8 }
  0x34   : > { %745 = vmatprep.subr.bf16.mxu0 %v3271_v1 }
  0x37   : > { %746 = vmatpush1.bf16.msra.mxu0 %v3119_v9 }
  0x38   : > { %747 = vmatprep.subr.bf16.mxu0 %v3271_v1 }
  0x3b   : > { %748 = vmatpush1.bf16.msra.mxu0 %v3120_v10 }
  0x3c   : > { %749 = vmatprep.subr.bf16.mxu0 %v3271_v1 }
  0x3f   : > { %750 = vmatpush1.bf16.msra.mxu0 %v3121_v11 }
  0x40   : > { %751 = vmatprep.subr.bf16.mxu0 %v3271_v1 }
  0x43   : > { %752 = vmatpush1.bf16.msra.mxu0 %v3122_v12 }
  0x44   : > { %753 = vmatprep.subr.bf16.mxu0 %v3271_v1 }
  0x47   : > { %754 = vmatpush1.bf16.msra.mxu0 %v3123_v13  ;;  %v804_v13 = vlaneseq }
  0x48   : > { %755 = vmatprep.subr.bf16.mxu0 %v3271_v1 }
  0x4b   : > { %756 = vmatpush1.bf16.msra.mxu0 %v3124_v14  ;;  %v805_v14 = vand.u32 127, %v804_v13 }
  0x4c   : > { %2914 = vmatprep.subr.bf16.mxu0 %v3272_v45 }
  0x4d   : > { %vm806_vm4 = vcmp.lt.s32.totalorder %v805_v14, 5 }
  0x4e   : > { %766 = vmatmul.mubr.bf16.vlgmr.msra.gmra.mrb[0].mxu0 %v654_v16  ;;  %v3564_v16 = vsel %vm806_vm4, 0.0, %v3281_v15 }
  0x4f   : > { %2916 = vmatprep.mubr.msk.bf16.mxu0 %vm3273_vm2, %v3272_v45 }
 0x121   : > { %v767_v18 = vpop.f32.mrb[0].mxu0 }
 0x122   : > { %v768_v19 = vadd.f32 %v767_v18, %v656_v17  ;;  %v769_v20 = vpop.f32.mrb[1].mxu0 }
 0x123   : > { %v770_v21 = vpop.f32.mrb[2].mxu0 }
 0x124   : > { %v771_v22 = vpop.f32.mrb[3].mxu0  ;;  %v776_v23 = vsel %vm775_vm1, %v768_v19, 0.0 }
 0x125   : > { %777 = vadd.xlane.f32.xlu0 %v776_v23 }
 0x1b2   : > { %v778_v24 = vpop.xlane.xlu0 %777 }
 0x1b3   : > { %v780_v25 = vmul.f32 0.03125, %v778_v24 }
 0x1b5   : > { %v781_v26 = vsub.f32 %v768_v19, %v780_v25 }
 0x1b7   : > { %v782_v27 = vmul.f32 %v781_v26, %v781_v26 }
 0x1b9   : > { %v783_v28 = vsel %vm775_vm1, %v782_v27, 0.0 }
 0x1ba   : > { %784 = vadd.xlane.f32.xlu0 %v783_v28 }
 0x247   : > { %v785_v29 = vpop.xlane.xlu0 %784 }
 0x248   : > { %v786_v30 = vmul.f32 0.03125, %v785_v29 }
 0x24a   : > { %v787_v31 = vadd.f32 1e-05, %v786_v30 }
 0x24c   : > { %3155 = vrsqrt.f32 %v787_v31 }
 0x256   : > { %v3156_v32 = vpop.eup %3155 }
 0x257   : > { %v789_v34 = vmul.f32 %v3156_v32, %v781_v26 }
 0x259   : > { %v796_v36 = vmul.f32 %v2680_v33, %v789_v34 }
 0x25b   : > { %v3499_v37 = vadd.f32 %v2681_v35, %v796_v36 }
 0x25d   : > { %v810_v38 = vsel %vm775_vm1, %v3499_v37, 0.0 }
 0x25e   : > { %811 = vadd.xlane.f32.xlu1 %v810_v38 }
 0x2eb   : > { %v812_v39 = vpop.xlane.xlu1 %811 }
 0x2ec   : > { %v813_v40 = vmul.f32 0.03125, %v812_v39 }
 0x2ee   : > { %v814_v41 = vsub.f32 %v3499_v37, %v813_v40 }
 0x2f0   : > { %v815_v42 = vmul.f32 %v814_v41, %v814_v41 }
 0x2f2   : > { %v816_v43 = vsel %vm775_vm1, %v815_v42, 0.0 }
 0x2f3   : > { %817 = vadd.xlane.f32.xlu1 %v816_v43 }
 0x380   : > { %v818_v47 = vpop.xlane.xlu1 %817 }
 0x381   : > { %v819_v48 = vmul.f32 0.03125, %v818_v47 }
 0x383   : > { %v820_v49 = vadd.f32 1e-05, %v819_v48 }
 0x385   : > { %3157 = vrsqrt.f32 %v820_v49 }
 0x38f   : > { %v3158_v50 = vpop.eup %3157 }
 0x390   : > { %v822_v52 = vmul.f32 %v3158_v50, %v814_v41 }
 0x392   : > { %v829_v54 = vmul.f32 %v2682_v51, %v822_v52 }
 0x394   : > { %v836_v55 = vadd.f32 %v2683_v53, %v829_v54 }
 0x396   : > { %v841_v56 = vpack.c.bf16 %v836_v55, %v836_v55 }
 0x398   : > { %2869 = vmatmul.mubr.msk.bf16.vlgmr.msra.gmra.mrb[0].mxu1 %vm775_vm1, %v841_v56 }
 0x399   : > { %2874 = vmatprep.mubr.msk.bf16.mxu1 %vm3273_vm2, %v3272_v45 }
 0x46b   : > { %v898_v58 = vpop.f32.mrb[0].mxu1 }
 0x46c   : > { %v899_v59 = vadd.f32 %v2684_v57, %v898_v58  ;;  %v2870_v60 = vpop.f32.mrb[1].mxu1 }
 0x46d   : > { %v901_v61 = vpop.f32.mrb[2].mxu1 }
 0x46e   : > { %v904_v62 = vmul.f32 0.35355338, %v899_v59  ;;  %v3531_v63 = vpack.c.bf16 %v899_v59, %v899_v59  ;;  %v2871_v0 = vpop.f32.mrb[3].mxu1 }
 0x470   : > { %960 = vrot.lane.b32.xlu1 %v3531_v63, %s3274_s25  ;;  %908 = vrot.lane.b32.xlu0 %v3531_v63, %s3275_s26  ;;  %v905_v1 = vpack.c.bf16 %v904_v62, %v904_v62 }
 0x474   : > { %1008 = vrot.lane.b32.xlu0 %v905_v1, %s3969_s23  ;;  %958 = vrot.lane.b32.xlu1 %v905_v1, %s3277_s3  ;;  %s3990_s23 = smov 80  }
 0x478   : > { %1058 = vrot.lane.b32.xlu0 %v905_v1, %s3278_s28  ;;  %1010 = vrot.lane.b32.xlu1 %v3531_v63, %s3970_s20  ;;  %s3999_s20 = sld [smem:[#allocation16_spill]] }
 0x47c   : > { %1060 = vrot.lane.b32.xlu1 %v3531_v63, %s3280_s24 }
 0x4e2   : > { %v909_v2 = vpop.permute.xlu0 %908  ;;  %v961_v4 = vpop.permute.xlu1 %960 }
 0x4e3   : > { %v915_v3 = vsel %vm910_vm3, %v909_v2, 0  ;;  %v966_v6 = vsel %vm910_vm3, %v961_v4, 0 }
 0x4e4   : > { %2873 = vmatpush3.bf16.xpose.msra.mxu1 %v915_v3 }
 0x4e5   : > { %2878 = vmatprep.subr.bf16.mxu1 %v3272_v45 }
 0x4e6   : > { %v959_v5 = vpop.permute.xlu1 %958  ;;  %v1009_v10 = vpop.permute.xlu0 %1008 }
 0x4ea   : > { %v1011_v7 = vpop.permute.xlu1 %1010  ;;  %v1059_v12 = vpop.permute.xlu0 %1058 }
 0x4eb   : > { %2875 = vmatmul.mubr.msk.bf16.vlgmr.msra.gmra.mrb[4].mxu1 %vm910_vm3, %v905_v1  ;;  %v1016_v8 = vsel %vm910_vm3, %v1011_v7, 0 }
 0x4ec   : > { %2879 = vmatpush3.bf16.xpose.msra.mxu1 %v966_v6  ;;  %2880 = vmatprep.mubr.msk.bf16.mxu1 %vm3273_vm2, %v3272_v45 }
 0x4ed   : > { %2884 = vmatprep.subr.bf16.mxu1 %v3272_v45 }
 0x4ee   : > { %v1061_v9 = vpop.permute.xlu1 %1060 }
 0x4ef   : > { %v1066_v11 = vsel %vm910_vm3, %v1061_v9, 0 }
 0x4f3   : > { %2881 = vmatmul.mubr.msk.bf16.vlgmr.msra.gmra.mrb[8].mxu1 %vm910_vm3, %v959_v5 }
 0x4f4   : > { %2885 = vmatpush3.bf16.xpose.msra.mxu1 %v1016_v8  ;;  %2886 = vmatprep.mubr.msk.bf16.mxu1 %vm3273_vm2, %v3272_v45 }
 0x4f5   : > { %2890 = vmatprep.subr.bf16.mxu1 %v3272_v45 }
 0x4fb   : > { %2887 = vmatmul.mubr.msk.bf16.vlgmr.msra.gmra.mrb[12].mxu1 %vm910_vm3, %v1009_v10 }
 0x4fc   : > { %2891 = vmatpush3.bf16.xpose.msra.mxu1 %v1066_v11  ;;  %2892 = vmatprep.mubr.msk.bf16.mxu1 %vm3273_vm2, %v3272_v45 }
 0x4fd   : > { %2896 = vmatprep.subr.bf16.mxu1 %v3272_v45 }
 0x503   : > { %2893 = vmatmul.mubr.msk.bf16.vlgmr.msra.gmra.mrb[16].mxu1 %vm910_vm3, %v1059_v12 }
 0x504   : > { %2898 = vmatprep.mubr.msk.bf16.mxu1 %vm3273_vm2, %v3272_v45 }
 0x5be   : > { %v951_v17 = vpop.f32.mrb[4].mxu1 }
 0x5bf   : > { %v1108_v18 = vadd.f32 %v951_v17, %v3564_v16  ;;  %v2876_v19 = vpop.f32.mrb[5].mxu1 }
 0x5c0   : > { %v954_v20 = vpop.f32.mrb[6].mxu1 }
 0x5c1   : > { %v2877_v21 = vpop.f32.mrb[7].mxu1  ;;  %v1112_v22 = vsel %vm910_vm3, %v1108_v18, -inf }
 0x5c2   : > { %1113 = vmax.xlane.f32.xlu1 %v1112_v22 }
 0x5c6   : > { %v1002_v23 = vpop.f32.mrb[8].mxu1 }
 0x5c7   : > { %v1109_v24 = vadd.f32 %v1002_v23, %v3564_v16  ;;  %v2882_v25 = vpop.f32.mrb[9].mxu1 }
 0x5c8   : > { %v1005_v26 = vpop.f32.mrb[10].mxu1 }
 0x5c9   : > { %v2883_v27 = vpop.f32.mrb[11].mxu1  ;;  %v1115_v28 = vsel %vm910_vm3, %v1109_v24, -inf }
 0x5ca   : > { %1116 = vmax.xlane.f32.xlu0 %v1115_v28  ;;  %v3127_v28 = vld [vmem:[%s3942_s9] sm:$0xff]  }
 0x5ce   : > { %v1052_v29 = vpop.f32.mrb[12].mxu1 }
 0x5cf   : > { %v1110_v30 = vadd.f32 %v1052_v29, %v3564_v16  ;;  %v2888_v31 = vpop.f32.mrb[13].mxu1  ;;  %v3128_v29 = vld [vmem:[%s3942_s9 + $0x8] sm:$0xff]  }
 0x5d0   : > { %v1055_v32 = vpop.f32.mrb[14].mxu1 }
 0x5d1   : > { %v2889_v33 = vpop.f32.mrb[15].mxu1  ;;  %v1118_v34 = vsel %vm910_vm3, %v1110_v30, -inf }
 0x5d2   : > { %1119 = vmax.xlane.f32.xlu0 %v1118_v34 }
 0x5d3   : > { %1157 = vrot.lane.b32.xlu1 %v3531_v63, %s3965_s29  ;;  %s3968_s29 = smov 8  }
 0x5d6   : > { %v1102_v35 = vpop.f32.mrb[16].mxu1 }
 0x5d7   : > { %v1111_v36 = vadd.f32 %v1102_v35, %v3564_v16  ;;  %v2894_v38 = vpop.f32.mrb[17].mxu1 }
 0x5d8   : > { %v1105_v39 = vpop.f32.mrb[18].mxu1 }
 0x5d9   : > { %v2895_v40 = vpop.f32.mrb[19].mxu1  ;;  %v1121_v41 = vsel %vm910_vm3, %v1111_v36, -inf }
 0x5da   : > { %1122 = vmax.xlane.f32.xlu0 %v1121_v41 }
 0x64f   : > { %v1114_v42 = vpop.xlane.xlu1 %1113 }
 0x650   : > { %v1124_v43 = vsub.f32 %v1108_v18, %v1114_v42 }
 0x652   : > { %v1128_v44 = vmul.f32 1.442695, %v1124_v43 }
 0x653   : > { %v1158_v46 = vpop.permute.xlu1 %1157 }
 0x654   : > { %3159 = vpow2.f32 %v1128_v44  ;;  %v1164_v47 = vsel %vm1162_vm5, %v1158_v46, 0 }
 0x655   : > { %2897 = vmatpush3.bf16.msra.mxu1 %v1164_v47 }
 0x656   : > { %2902 = vmatprep.subr.bf16.mxu1 %v3272_v45 }
 0x657   : > { %v1117_v48 = vpop.xlane.xlu0 %1116 }
 0x658   : > { %v1125_v49 = vsub.f32 %v1109_v24, %v1117_v48 }
 0x65a   : > { %v1130_v50 = vmul.f32 1.442695, %v1125_v49 }
 0x65c   : > { %3161 = vpow2.f32 %v1130_v50 }
 0x65e   : > { %v3160_v51 = vpop.eup %3159 }
 0x65f   : > { %v1120_v52 = vpop.xlane.xlu0 %1119  ;;  %v1136_v53 = vsel %vm910_vm3, %v3160_v51, 0.0 }
 0x660   : > { %v1126_v54 = vsub.f32 %v1110_v30, %v1120_v52  ;;  %1137 = vadd.xlane.f32.xlu1 %v1136_v53  ;;  %v2699_v52 = vld [vmem:[%s3943_s10] ss:$0 sm:$0xff] }
 0x662   : > { %v1132_v55 = vmul.f32 1.442695, %v1126_v54 }
 0x664   : > { %3163 = vpow2.f32 %v1132_v55 }
 0x666   : > { %v3162_v56 = vpop.eup %3161 }
 0x667   : > { %v1123_v57 = vpop.xlane.xlu0 %1122  ;;  %v1139_v58 = vsel %vm910_vm3, %v3162_v56, 0.0 }
 0x668   : > { %v1127_v59 = vsub.f32 %v1111_v36, %v1123_v57  ;;  %1140 = vadd.xlane.f32.xlu0 %v1139_v58 }
 0x66a   : > { %v1134_v60 = vmul.f32 1.442695, %v1127_v59 }
 0x66c   : > { %3165 = vpow2.f32 %v1134_v60 }
 0x66e   : > { %v3164_v61 = vpop.eup %3163 }
 0x66f   : > { %v1142_v62 = vsel %vm910_vm3, %v3164_v61, 0.0 }
 0x670   : > { %1143 = vadd.xlane.f32.xlu1 %v1142_v62 }
 0x676   : > { %v3166_v0 = vpop.eup %3165 }
 0x677   : > { %v1145_v1 = vsel %vm910_vm3, %v3166_v0, 0.0 }
 0x678   : > { %1146 = vadd.xlane.f32.xlu0 %v1145_v1  ;;  %v3130_v1 = vld [vmem:[%s3946_s13 + $0x8] sm:$0xff]  }
 0x681   : > { %1256 = vrot.lane.b32.xlu1 %v3531_v63, %s3964_s1 }
 0x685   : > { %1305 = vrot.lane.b32.xlu1 %v3531_v63, %s3962_s27  ;;  %s3967_s27 = smov 24  }
 0x68e   : > { %1207 = vrot.lane.b32.xlu0 %v3531_v63, %s3963_s30 }
 0x6ed   : > { %v1138_v2 = vpop.xlane.xlu1 %1137 }
 0x6ee   : > { %3167 = vrcp.f32 %v1138_v2 }
 0x6f5   : > { %v1141_v4 = vpop.xlane.xlu0 %1140 }
 0x6f6   : > { %3169 = vrcp.f32 %v1141_v4 }
 0x6f8   : > { %v3168_v3 = vpop.eup %3167 }
 0x6f9   : > { %v1152_v5 = vmul.f32 %v3168_v3, %v3160_v51 }
 0x6fb   : > { %v1156_v6 = vpack.c.bf16 %v1152_v5, %v1152_v5 }
 0x6fd   : > { %2899 = vmatmul.mubr.msk.bf16.vlgmr.msra.gmra.mrb[20].mxu1 %vm910_vm3, %v1156_v6  ;;  %v1144_v7 = vpop.xlane.xlu1 %1143  ;;  %v2700_v6 = vld [vmem:[%s3944_s11] ss:$0 sm:$0xff] }
 0x6fe   : > { %2904 = vmatprep.mubr.msk.bf16.mxu1 %vm3273_vm2, %v3272_v45  ;;  %3171 = vrcp.f32 %v1144_v7 }
 0x700   : > { %v3170_v9 = vpop.eup %3169 }
 0x701   : > { %v1257_v8 = vpop.permute.xlu1 %1256  ;;  %v1153_v12 = vmul.f32 %v3170_v9, %v3162_v56 }
 0x702   : > { %v1262_v18 = vsel %vm1162_vm5, %v1257_v8, 0  ;;  %v2701_v8 = vld [vmem:[%s3945_s12] ss:$0 sm:$0xff] }
 0x703   : > { %v1206_v15 = vpack.c.bf16 %v1153_v12, %v1153_v12  ;;  %v3132_v12 = vld [vmem:[%s3948_s15 + $0x8] sm:$0xff]  }
 0x705   : > { %v1306_v10 = vpop.permute.xlu1 %1305  ;;  %v1147_v11 = vpop.xlane.xlu0 %1146 }
 0x706   : > { %v1311_v63 = vsel %vm1162_vm5, %v1306_v10, 0  ;;  %3173 = vrcp.f32 %v1147_v11 }
 0x707   : > { %2915 = vmatpush3.bf16.msra.mxu0 %v1311_v63  ;;  %v3131_v63 = vld [vmem:[%s3948_s15] sm:$0xff]  }
 0x708   : > { %2928 = vmatprep.subr.bf16.mxu0 %v3272_v45  ;;  %v3172_v17 = vpop.eup %3171 }
 0x709   : > { %v1208_v13 = vpop.permute.xlu0 %1207  ;;  %v1154_v20 = vmul.f32 %v3172_v17, %v3164_v61  ;;  %v3136_v17 = vld [vmem:[%s3948_s15 + $0x28] sm:$0xff]  }
 0x70a   : > { %v1213_v14 = vsel %vm1162_vm5, %v1208_v13, 0  ;;  %v3133_v13 = vld [vmem:[%s3948_s15 + $0x10] sm:$0xff]  }
 0x70b   : > { %2903 = vmatpush3.bf16.msra.mxu1 %v1213_v14  ;;  %v1255_v23 = vpack.c.bf16 %v1154_v20, %v1154_v20  ;;  %v3134_v14 = vld [vmem:[%s3948_s15 + $0x18] sm:$0xff]   ;;  %v2702_v20 = vld [vmem:[%s3947_s14] ss:$0 sm:$0xff] }
 0x70c   : > { %2908 = vmatprep.subr.bf16.mxu1 %v3272_v45 }
 0x70e   : > { %2905 = vmatmul.mubr.msk.bf16.vlgmr.msra.gmra.mrb[24].mxu1 %vm910_vm3, %v1206_v15  ;;  %v3135_v15 = vld [vmem:[%s3948_s15 + $0x20] sm:$0xff]  }
 0x70f   : > { %2909 = vmatpush3.bf16.msra.mxu1 %v1262_v18  ;;  %2910 = vmatprep.mubr.msk.bf16.mxu1 %vm3273_vm2, %v3272_v45  ;;  %v3137_v18 = vld [vmem:[%s3948_s15 + $0x30] sm:$0xff]  }
 0x710   : > { %v3174_v19 = vpop.eup %3173  ;;  %2920 = vmatprep.subr.bf16.mxu1 %v3272_v45 }
 0x711   : > { %v1155_v21 = vmul.f32 %v3174_v19, %v3166_v0  ;;  %v3138_v19 = vld [vmem:[%s3948_s15 + $0x38] sm:$0xff]  }
 0x713   : > { %v1304_v22 = vpack.c.bf16 %v1155_v21, %v1155_v21 }
 0x715   : > { %2917 = vmatmul.mubr.msk.bf16.vlgmr.msra.gmra.mrb[4].mxu0 %vm910_vm3, %v1304_v22 }
 0x716   : > { %2911 = vmatmul.mubr.msk.bf16.vlgmr.msra.gmra.mrb[28].mxu1 %vm910_vm3, %v1255_v23  ;;  %2932 = vmatprep.mubr.msk.bf16.mxu0 %vm3273_vm2, %v3272_v45 }
 0x717   : > { %2924 = vmatprep.mubr.msk.bf16.mxu1 %vm3273_vm2, %v3272_v45  ;;  %2921 = vmatpush3.bf16.msra.mxu1 %v3127_v28 }
 0x718   : > { %2922 = vmatprep.subr.bf16.mxu1 %v3272_v45 }
 0x71b   : > { %2923 = vmatpush3.bf16.msra.mxu1 %v3128_v29 }
 0x71c   : > { %2936 = vmatprep.subr.bf16.mxu1 %v3272_v45 }
 0x7d0   : > { %v1200_v24 = vpop.f32.mrb[20].mxu1 }
 0x7d1   : > { %v2900_v25 = vpop.f32.mrb[21].mxu1 }
 0x7d2   : > { %v1203_v26 = vpop.f32.mrb[22].mxu1 }
 0x7d3   : > { %v2901_v27 = vpop.f32.mrb[23].mxu1 }
 0x7e1   : > { %v1249_v30 = vpop.f32.mrb[24].mxu1 }
 0x7e2   : > { %1354 = vrot.lane.b32.xlu1 %v1249_v30, %s3968_s29  ;;  %v2906_v31 = vpop.f32.mrb[25].mxu1  ;;  %s3991_s29 = smov 112  }
 0x7e3   : > { %v1252_v32 = vpop.f32.mrb[26].mxu1 }
 0x7e4   : > { %v2907_v33 = vpop.f32.mrb[27].mxu1 }
 0x7e8   : > { %v1347_v34 = vpop.f32.mrb[4].mxu0 }
 0x7e9   : > { %v2918_v35 = vpop.f32.mrb[5].mxu0  ;;  %1362 = vrot.lane.b32.xlu1 %v1347_v34, %s3967_s27  ;;  %v1298_v36 = vpop.f32.mrb[28].mxu1  ;;  %v2715_v34 = vld [vmem:[%s3949_s16] ss:$0 sm:$0xff] }
 0x7ea   : > { %v1350_v38 = vpop.f32.mrb[6].mxu0  ;;  %1358 = vrot.lane.b32.xlu0 %v1298_v36, %s3966_s0  ;;  %v2912_v39 = vpop.f32.mrb[29].mxu1  ;;  %s3997_s0 = smov 24  }
 0x7eb   : > { %v1301_v40 = vpop.f32.mrb[30].mxu1  ;;  %v2919_v41 = vpop.f32.mrb[7].mxu0 }
 0x7ec   : > { %v2913_v42 = vpop.f32.mrb[31].mxu1 }
 0x854   : > { %v1355_v43 = vpop.permute.xlu1 %1354 }
 0x855   : > { %v1365_v44 = vsel %vm910_vm3, %v1200_v24, %v1355_v43 }
 0x85b   : > { %v1363_v47 = vpop.permute.xlu1 %1362 }
 0x85c   : > { %v1359_v46 = vpop.permute.xlu0 %1358 }
 0x85d   : > { %v1367_v48 = vsel %vm1366_vm6, %v1365_v44, %v1359_v46 }
 0x85e   : > { %v1369_v49 = vsel %vm1368_vm7, %v1367_v48, %v1363_v47  ;;  %v3139_v48 = vld [vmem:[%s3940_s7 + $0x10] sm:$0xff]  }
 0x85f   : > { %v1374_v50 = vpack.c.bf16 %v1369_v49, %v1369_v49  ;;  %v3140_v49 = vld [vmem:[%s3940_s7 + $0x18] sm:$0xff]  }
 0x861   : > { %2925 = vmatmul.mubr.msk.bf16.vlgmr.msra.gmra.mrb[32].mxu1 %vm775_vm1, %v1374_v50 }
 0x862   : > { %2952 = vmatprep.mubr.msk.bf16.mxu1 %vm3273_vm2, %v3272_v45  ;;  %2937 = vmatpush3.bf16.msra.mxu1 %v3131_v63 }
 0x863   : > { %2938 = vmatprep.subr.bf16.mxu1 %v3272_v45 }
 0x866   : > { %2939 = vmatpush3.bf16.msra.mxu1 %v3132_v12 }
 0x867   : > { %2940 = vmatprep.subr.bf16.mxu1 %v3272_v45 }
 0x86a   : > { %2941 = vmatpush3.bf16.msra.mxu1 %v3133_v13 }
 0x86b   : > { %2942 = vmatprep.subr.bf16.mxu1 %v3272_v45 }
 0x86e   : > { %2943 = vmatpush3.bf16.msra.mxu1 %v3134_v14 }
 0x86f   : > { %2944 = vmatprep.subr.bf16.mxu1 %v3272_v45 }
 0x872   : > { %2945 = vmatpush3.bf16.msra.mxu1 %v3135_v15 }
 0x873   : > { %2946 = vmatprep.subr.bf16.mxu1 %v3272_v45 }
 0x876   : > { %2947 = vmatpush3.bf16.msra.mxu1 %v3136_v17 }
 0x877   : > { %2948 = vmatprep.subr.bf16.mxu1 %v3272_v45 }
 0x87a   : > { %2949 = vmatpush3.bf16.msra.mxu1 %v3137_v18 }
 0x87b   : > { %2950 = vmatprep.subr.bf16.mxu1 %v3272_v45 }
 0x87e   : > { %2951 = vmatpush3.bf16.msra.mxu1 %v3138_v19 }
 0x87f   : > { %2982 = vmatprep.subr.bf16.mxu1 %v3272_v45 }
 0x934   : > { %v1424_v51 = vpop.f32.mrb[32].mxu1 }
 0x935   : > { %v1430_v53 = vadd.f32 %v1424_v51, %v3499_v37  ;;  %v2926_v54 = vpop.f32.mrb[33].mxu1  ;;  %v3129_v37 = vld [vmem:[%s3946_s13] sm:$0xff]  }
 0x936   : > { %v1427_v55 = vpop.f32.mrb[34].mxu1  ;;  %2929 = vmatpush3.bf16.msra.mxu0 %v3129_v37  ;;  %v2718_v54 = vld [vmem:[%s3938_s5 + $0x1] ss:$0 sm:$0xff] }
 0x937   : > { %v3627_v56 = vadd.f32 %v2699_v52, %v1430_v53  ;;  %v2927_v57 = vpop.f32.mrb[35].mxu1  ;;  %2930 = vmatprep.subr.bf16.mxu0 %v3272_v45 }
 0x939   : > { %v1441_v58 = vsel %vm775_vm1, %v3627_v56, 0.0 }
 0x93a   : > { %1442 = vadd.xlane.f32.xlu0 %v1441_v58  ;;  %2931 = vmatpush3.bf16.msra.mxu0 %v3130_v1 }
 0x93b   : > { %2956 = vmatprep.subr.bf16.mxu0 %v3272_v45 }
 0x9c7   : > { %v1443_v59 = vpop.xlane.xlu0 %1442 }
 0x9c8   : > { %v1444_v60 = vmul.f32 0.03125, %v1443_v59 }
 0x9ca   : > { %v1445_v61 = vsub.f32 %v3627_v56, %v1444_v60  ;;  %v2725_v60 = vld [vmem:[%s3941_s8 + $0x1] ss:$0 sm:$0xff] }
 0x9cc   : > { %v1446_v62 = vmul.f32 %v1445_v61, %v1445_v61 }
 0x9ce   : > { %v1447_v0 = vsel %vm775_vm1, %v1446_v62, 0.0 }
 0x9cf   : > { %1448 = vadd.xlane.f32.xlu1 %v1447_v0 }
 0xa5c   : > { %v1449_v2 = vpop.xlane.xlu1 %1448 }
 0xa5d   : > { %v1450_v3 = vmul.f32 0.03125, %v1449_v2 }
 0xa5f   : > { %v1451_v4 = vadd.f32 1e-05, %v1450_v3 }
 0xa61   : > { %3175 = vrsqrt.f32 %v1451_v4 }
 0xa6b   : > { %v3176_v5 = vpop.eup %3175 }
 0xa6c   : > { %v1453_v7 = vmul.f32 %v3176_v5, %v1445_v61 }
 0xa6e   : > { %v1460_v9 = vmul.f32 %v2700_v6, %v1453_v7 }
 0xa70   : > { %v1467_v10 = vadd.f32 %v2701_v8, %v1460_v9 }
 0xa72   : > { %v1472_v11 = vpack.c.bf16 %v1467_v10, %v1467_v10 }
 0xa74   : > { %2933 = vmatmul.mubr.msk.bf16.vlgmr.msra.gmra.mrb[8].mxu0 %vm775_vm1, %v1472_v11 }
 0xa75   : > { %2960 = vmatprep.mubr.msk.bf16.mxu0 %vm3273_vm2, %v3272_v45  ;;  %2957 = vmatpush3.bf16.msra.mxu0 %v3139_v48 }
 0xa76   : > { %2958 = vmatprep.subr.bf16.mxu0 %v3272_v45 }
 0xa79   : > { %2959 = vmatpush3.bf16.msra.mxu0 %v3140_v49 }
 0xa7a   : > { %2964 = vmatprep.subr.bf16.mxu0 %v3272_v45 }
 0xb47   : > { %v1529_v21 = vpop.f32.mrb[8].mxu0 }
 0xb48   : > { %v1530_v22 = vadd.f32 %v2702_v20, %v1529_v21  ;;  %v2934_v23 = vpop.f32.mrb[9].mxu0 }
 0xb49   : > { %v1532_v24 = vpop.f32.mrb[10].mxu0 }
 0xb4a   : > { %v2706_v25 = vmul.f32 -1.702, %v1530_v22  ;;  %v2935_v26 = vpop.f32.mrb[11].mxu0 }
 0xb4c   : > { %v1537_v27 = vmul.f32 1.442695, %v2706_v25 }
 0xb4e   : > { %3177 = vpow2.f32 %v1537_v27 }
 0xb58   : > { %v3178_v28 = vpop.eup %3177 }
 0xb59   : > { %v1539_v29 = vadd.f32 1.0, %v3178_v28 }
 0xb5b   : > { %3179 = vrcp.f32 %v1539_v29 }
 0xb65   : > { %v3180_v30 = vpop.eup %3179 }
 0xb66   : > { %v1542_v31 = vmul.f32 %v3180_v30, %v1530_v22 }
 0xb68   : > { %v1559_v32 = vpack.c.bf16 %v1542_v31, %v1542_v31 }
 0xb6a   : > { %2953 = vmatmul.mubr.bf16.vlgmr.msra.gmra.mrb[36].mxu1 %v1559_v32 }
 0xb6b   : > { %2984 = vmatprep.mubr.msk.bf16.mxu1 %vm3273_vm2, %v3272_v45 }
 0xc3d   : > { %v1642_v33 = vpop.f32.mrb[36].mxu1 }
 0xc3e   : > { %v1648_v35 = vadd.f32 %v1642_v33, %v3627_v56  ;;  %v2954_v36 = vpop.f32.mrb[37].mxu1  ;;  %v2719_v56 = vld [vmem:[%s3939_s6 + $0x1] ss:$0 sm:$0xff] }
 0xc3f   : > { %v1645_v38 = vpop.f32.mrb[38].mxu1 }
 0xc40   : > { %v3691_v39 = vadd.f32 %v2715_v34, %v1648_v35  ;;  %v2955_v40 = vpop.f32.mrb[39].mxu1 }
 0xc42   : > { %v1661_v41 = vsel %vm775_vm1, %v3691_v39, 0.0 }
 0xc43   : > { %1662 = vadd.xlane.f32.xlu0 %v1661_v41 }
 0xcd0   : > { %v1663_v42 = vpop.xlane.xlu0 %1662 }
 0xcd1   : > { %v1664_v43 = vmul.f32 0.03125, %v1663_v42 }
 0xcd3   : > { %v1665_v44 = vsub.f32 %v3691_v39, %v1664_v43 }
 0xcd5   : > { %v1666_v46 = vmul.f32 %v1665_v44, %v1665_v44 }
 0xcd7   : > { %v1667_v47 = vsel %vm775_vm1, %v1666_v46, 0.0 }
 0xcd8   : > { %1668 = vadd.xlane.f32.xlu0 %v1667_v47 }
 0xd65   : > { %v1669_v50 = vpop.xlane.xlu0 %1668 }
 0xd66   : > { %v1670_v51 = vmul.f32 0.03125, %v1669_v50 }
 0xd68   : > { %v1671_v52 = vadd.f32 1e-05, %v1670_v51 }
 0xd6a   : > { %3181 = vrsqrt.f32 %v1671_v52 }
 0xd74   : > { %v3182_v53 = vpop.eup %3181 }
 0xd75   : > { %v1673_v55 = vmul.f32 %v3182_v53, %v1665_v44 }
 0xd77   : > { %v1680_v57 = vmul.f32 %v2718_v54, %v1673_v55 }
 0xd79   : > { %v1687_v58 = vadd.f32 %v2719_v56, %v1680_v57 }
 0xd7b   : > { %v1693_v59 = vpack.c.bf16 %v1687_v58, %v1687_v58 }
 0xd7d   : > { %2961 = vmatmul.mubr.msk.bf16.vlgmr.msra.gmra.mrb[12].mxu0 %vm775_vm1, %v1693_v59 }
 0xd7e   : > { %2966 = vmatprep.mubr.msk.bf16.mxu0 %vm3273_vm2, %v3272_v45 }
 0xe50   : > { %v1751_v61 = vpop.f32.mrb[12].mxu0 }
 0xe51   : > { %v1752_v62 = vadd.f32 %v2725_v60, %v1751_v61  ;;  %v2962_v0 = vpop.f32.mrb[13].mxu0 }
 0xe52   : > { %v1754_v37 = vpop.f32.mrb[14].mxu0 }
 0xe53   : > { %v1757_v1 = vmul.f32 0.35355338, %v1752_v62  ;;  %v3717_v2 = vpack.c.bf16 %v1752_v62, %v1752_v62  ;;  %v2963_v3 = vpop.f32.mrb[15].mxu0 }
 0xe55   : > { %1812 = vrot.lane.b32.xlu1 %v3717_v2, %s3274_s25  ;;  %1761 = vrot.lane.b32.xlu0 %v3717_v2, %s3275_s26  ;;  %v1758_v4 = vpack.c.bf16 %v1757_v1, %v1757_v1  ;;  %s3992_s25 = smov 64   ;;  %s3993_s26 = smov 48  }
 0xe59   : > { %1912 = vrot.lane.b32.xlu0 %v3717_v2, %s3280_s24  ;;  %1810 = vrot.lane.b32.xlu1 %v1758_v4, %s3277_s3  ;;  %s3994_s3 = smov 56   ;;  %s3996_s24 = smov 8  }
 0xe5d   : > { %1910 = vrot.lane.b32.xlu0 %v1758_v4, %s3278_s28  ;;  %1862 = vrot.lane.b32.xlu1 %v3717_v2, %s3990_s23  ;;  %s3995_s28 = smov 40   ;;  %s3998_s23 = smov 16  }
 0xe61   : > { %1860 = vrot.lane.b32.xlu1 %v1758_v4, %s3991_s29 }
 0xec7   : > { %v1762_v5 = vpop.permute.xlu0 %1761  ;;  %v1813_v7 = vpop.permute.xlu1 %1812 }
 0xec8   : > { %v1767_v6 = vsel %vm910_vm3, %v1762_v5, 0  ;;  %v1818_v11 = vsel %vm910_vm3, %v1813_v7, 0 }
 0xec9   : > { %2965 = vmatpush3.bf16.xpose.msra.mxu0 %v1767_v6 }
 0xeca   : > { %2970 = vmatprep.subr.bf16.mxu0 %v3272_v45 }
 0xecb   : > { %v1913_v8 = vpop.permute.xlu0 %1912  ;;  %v1811_v10 = vpop.permute.xlu1 %1810 }
 0xecc   : > { %v1918_v9 = vsel %vm910_vm3, %v1913_v8, 0 }
 0xecd   : > { %2983 = vmatpush3.bf16.xpose.msra.mxu1 %v1918_v9 }
 0xece   : > { %2994 = vmatprep.subr.bf16.mxu1 %v3272_v45 }
 0xecf   : > { %v1911_v63 = vpop.permute.xlu0 %1910  ;;  %v1863_v12 = vpop.permute.xlu1 %1862 }
 0xed0   : > { %2967 = vmatmul.mubr.msk.bf16.vlgmr.msra.gmra.mrb[16].mxu0 %vm910_vm3, %v1758_v4  ;;  %v1868_v13 = vsel %vm910_vm3, %v1863_v12, 0 }
 0xed1   : > { %2971 = vmatpush3.bf16.xpose.msra.mxu0 %v1818_v11  ;;  %2972 = vmatprep.mubr.msk.bf16.mxu0 %vm3273_vm2, %v3272_v45 }
 0xed2   : > { %2976 = vmatprep.subr.bf16.mxu0 %v3272_v45 }
 0xed3   : > { %v1861_v14 = vpop.permute.xlu1 %1860 }
 0xed4   : > { %2985 = vmatmul.mubr.msk.bf16.vlgmr.msra.gmra.mrb[40].mxu1 %vm910_vm3, %v1911_v63 }
 0xed5   : > { %2996 = vmatprep.mubr.msk.bf16.mxu1 %vm3273_vm2, %v3272_v45 }
 0xed8   : > { %2973 = vmatmul.mubr.msk.bf16.vlgmr.msra.gmra.mrb[20].mxu0 %vm910_vm3, %v1811_v10 }
 0xed9   : > { %2977 = vmatpush3.bf16.xpose.msra.mxu0 %v1868_v13  ;;  %2978 = vmatprep.mubr.msk.bf16.mxu0 %vm3273_vm2, %v3272_v45 }
 0xeda   : > { %2988 = vmatprep.subr.bf16.mxu0 %v3272_v45 }
 0xee0   : > { %2979 = vmatmul.mubr.msk.bf16.vlgmr.msra.gmra.mrb[24].mxu0 %vm910_vm3, %v1861_v14 }
 0xee1   : > { %2990 = vmatprep.mubr.msk.bf16.mxu0 %vm3273_vm2, %v3272_v45 }
 0xfa3   : > { %v1803_v15 = vpop.f32.mrb[16].mxu0 }
 0xfa4   : > { %v1960_v17 = vadd.f32 %v1803_v15, %v3564_v16  ;;  %v2968_v18 = vpop.f32.mrb[17].mxu0 }
 0xfa5   : > { %v1806_v19 = vpop.f32.mrb[18].mxu0 }
 0xfa6   : > { %v2969_v20 = vpop.f32.mrb[19].mxu0  ;;  %v1964_v21 = vsel %vm910_vm3, %v1960_v17, -inf }
 0xfa7   : > { %1965 = vmax.xlane.f32.xlu1 %v1964_v21  ;;  %v1954_v22 = vpop.f32.mrb[40].mxu1 }
 0xfa8   : > { %v2986_v23 = vpop.f32.mrb[41].mxu1  ;;  %v1963_v36 = vadd.f32 %v1954_v22, %v3564_v16 }
 0xfa9   : > { %v1957_v24 = vpop.f32.mrb[42].mxu1 }
 0xfaa   : > { %v2987_v25 = vpop.f32.mrb[43].mxu1  ;;  %v1973_v41 = vsel %vm910_vm3, %v1963_v36, -inf }
 0xfab   : > { %v1854_v26 = vpop.f32.mrb[20].mxu0 }
 0xfac   : > { %v1961_v27 = vadd.f32 %v1854_v26, %v3564_v16  ;;  %v2974_v28 = vpop.f32.mrb[21].mxu0 }
 0xfad   : > { %v1857_v29 = vpop.f32.mrb[22].mxu0 }
 0xfae   : > { %v2975_v30 = vpop.f32.mrb[23].mxu0  ;;  %v1967_v31 = vsel %vm910_vm3, %v1961_v27, -inf }
 0xfaf   : > { %1968 = vmax.xlane.f32.xlu0 %v1967_v31  ;;  %v3141_v30 = vld [vmem:[%s3942_s9 + $0x10] sm:$0xff]   ;;  %v3142_v31 = vld [vmem:[%s3942_s9 + $0x18] sm:$0xff]  }
 0xfb3   : > { %v1904_v32 = vpop.f32.mrb[24].mxu0 }
 0xfb4   : > { %v1962_v33 = vadd.f32 %v1904_v32, %v3564_v16  ;;  %v2980_v34 = vpop.f32.mrb[25].mxu0 }
 0xfb5   : > { %v1907_v35 = vpop.f32.mrb[26].mxu0 }
 0xfb6   : > { %v2981_v38 = vpop.f32.mrb[27].mxu0  ;;  %v1970_v40 = vsel %vm910_vm3, %v1962_v33, -inf }
 0xfb7   : > { %1971 = vmax.xlane.f32.xlu0 %v1970_v40 }
 0xfb8   : > { %2009 = vrot.lane.b32.xlu1 %v3717_v2, %s3992_s25 }
 0xfbb   : > { %1974 = vmax.xlane.f32.xlu0 %v1973_v41 }
0x1034   : > { %v1966_v42 = vpop.xlane.xlu1 %1965 }
0x1035   : > { %v1976_v43 = vsub.f32 %v1960_v17, %v1966_v42 }
0x1037   : > { %v1980_v44 = vmul.f32 1.442695, %v1976_v43 }
0x1038   : > { %v2010_v46 = vpop.permute.xlu1 %2009 }
0x1039   : > { %3183 = vpow2.f32 %v1980_v44  ;;  %v2015_v47 = vsel %vm1162_vm5, %v2010_v46, 0 }
0x103a   : > { %2989 = vmatpush3.bf16.msra.mxu0 %v2015_v47 }
0x103b   : > { %3000 = vmatprep.subr.bf16.mxu0 %v3272_v45 }
0x103c   : > { %v1969_v16 = vpop.xlane.xlu0 %1968 }
0x103d   : > { %v1977_v51 = vsub.f32 %v1961_v27, %v1969_v16 }
0x103f   : > { %v1982_v54 = vmul.f32 1.442695, %v1977_v51 }
0x1043   : > { %v3184_v48 = vpop.eup %3183 }
0x1044   : > { %v1972_v49 = vpop.xlane.xlu0 %1971  ;;  %v1988_v50 = vsel %vm910_vm3, %v3184_v48, 0.0 }
0x1045   : > { %1989 = vadd.xlane.f32.xlu1 %v1988_v50  ;;  %v1978_v60 = vsub.f32 %v1962_v33, %v1972_v49  ;;  %v2745_v50 = vld [vmem:[%s3943_s10 + $0x1] ss:$0 sm:$0xff] }
0x1047   : > { %v1984_v61 = vmul.f32 1.442695, %v1978_v60 }
0x1048   : > { %v1975_v52 = vpop.xlane.xlu0 %1974 }
0x1049   : > { %v1979_v53 = vsub.f32 %v1963_v36, %v1975_v52 }
0x104b   : > { %v1986_v55 = vmul.f32 1.442695, %v1979_v53 }
0x104d   : > { %3185 = vpow2.f32 %v1986_v55 }
0x104e   : > { %3187 = vpow2.f32 %v1982_v54 }
0x104f   : > { %3189 = vpow2.f32 %v1984_v61 }
0x1056   : > { %2107 = vrot.lane.b32.xlu1 %v3717_v2, %s3993_s26  ;;  %s620_s26 = sand.u32 1, %s3261_s22  }
0x1057   : > { %v3186_v56 = vpop.eup %3185 }
0x1058   : > { %v1997_v57 = vsel %vm910_vm3, %v3186_v56, 0.0  ;;  %v3188_v58 = vpop.eup %3187 }
0x1059   : > { %1998 = vadd.xlane.f32.xlu0 %v1997_v57  ;;  %v1991_v59 = vsel %vm910_vm3, %v3188_v58, 0.0  ;;  %v3190_v62 = vpop.eup %3189 }
0x105a   : > { %v1994_v0 = vsel %vm910_vm3, %v3190_v62, 0.0 }
0x105d   : > { %1992 = vadd.xlane.f32.xlu0 %v1991_v59 }
0x1073   : > { %2058 = vrot.lane.b32.xlu0 %v3717_v2, %s3994_s3  ;;  %s621_s3 = scalar_lea.vmem [#allocation2], %s620_s26 }
0x107a   : > { %1995 = vadd.xlane.f32.xlu1 %v1994_v0 }
0x108b   : > { %2156 = vrot.lane.b32.xlu1 %v3717_v2, %s3995_s28  ;;  %s2606_s28 = sshll.u32 %s621_s3, 4  ;;  %s3888_s28 = int_to_ptr.vmem [resolvable:$true] %s2606_s28 }
0x10d2   : > { %v1990_v37 = vpop.xlane.xlu1 %1989 }
0x10d3   : > { %3191 = vrcp.f32 %v1990_v37 }
0x10d6   : > { %v2108_v4 = vpop.permute.xlu1 %2107 }
0x10d7   : > { %v2113_v6 = vsel %vm1162_vm5, %v2108_v4, 0  ;;  %v2748_v4 = vld [vmem:[%s3944_s11 + $0x1] ss:$0 sm:$0xff] }
0x10dd   : > { %v3192_v1 = vpop.eup %3191 }
0x10de   : > { %v2004_v3 = vmul.f32 %v3192_v1, %v3184_v48 }
0x10e0   : > { %v2008_v5 = vpack.c.bf16 %v2004_v3, %v2004_v3 }
0x10e2   : > { %2991 = vmatmul.mubr.msk.bf16.vlgmr.msra.gmra.mrb[28].mxu0 %vm910_vm3, %v2008_v5 }
0x10e3   : > { %3001 = vmatpush3.bf16.msra.mxu0 %v2113_v6  ;;  %3002 = vmatprep.mubr.msk.bf16.mxu0 %vm3273_vm2, %v3272_v45  ;;  %v2749_v6 = vld [vmem:[%s3945_s12 + $0x1] ss:$0 sm:$0xff] }
0x10e4   : > { %3012 = vmatprep.subr.bf16.mxu0 %v3272_v45 }
0x10e6   : > { %v1999_v7 = vpop.xlane.xlu0 %1998 }
0x10ea   : > { %v1993_v8 = vpop.xlane.xlu0 %1992 }
0x10eb   : > { %3193 = vrcp.f32 %v1993_v8 }
0x10ec   : > { %3195 = vrcp.f32 %v1999_v7 }
0x10ee   : > { %v2059_v2 = vpop.permute.xlu0 %2058 }
0x10ef   : > { %v2064_v9 = vsel %vm1162_vm5, %v2059_v2, 0 }
0x10f0   : > { %2995 = vmatpush3.bf16.msra.mxu1 %v2064_v9  ;;  %v3145_v9 = vld [vmem:[%s3948_s15 + $0x40] sm:$0xff]  }
0x10f1   : > { %3006 = vmatprep.subr.bf16.mxu1 %v3272_v45 }
0x10f5   : > { %v3194_v10 = vpop.eup %3193 }
0x10f6   : > { %v2005_v11 = vmul.f32 %v3194_v10, %v3188_v58  ;;  %v3196_v12 = vpop.eup %3195  ;;  %v3146_v10 = vld [vmem:[%s3948_s15 + $0x48] sm:$0xff]  }
0x10f7   : > { %v2007_v14 = vmul.f32 %v3196_v12, %v3186_v56  ;;  %v3149_v12 = vld [vmem:[%s3948_s15 + $0x60] sm:$0xff]  }
0x10f8   : > { %v2057_v63 = vpack.c.bf16 %v2005_v11, %v2005_v11  ;;  %v3147_v11 = vld [vmem:[%s3948_s15 + $0x50] sm:$0xff]  }
0x10f9   : > { %v2155_v18 = vpack.c.bf16 %v2007_v14, %v2007_v14  ;;  %v3151_v14 = vld [vmem:[%s3948_s15 + $0x70] sm:$0xff]  }
0x10fa   : > { %2997 = vmatmul.mubr.msk.bf16.vlgmr.msra.gmra.mrb[44].mxu1 %vm910_vm3, %v2057_v63  ;;  %v3148_v63 = vld [vmem:[%s3948_s15 + $0x58] sm:$0xff]  }
0x10fb   : > { %3008 = vmatprep.mubr.msk.bf16.mxu1 %vm3273_vm2, %v3272_v45 }
0x1107   : > { %v1996_v13 = vpop.xlane.xlu1 %1995 }
0x1108   : > { %3197 = vrcp.f32 %v1996_v13  ;;  %v3150_v13 = vld [vmem:[%s3948_s15 + $0x68] sm:$0xff]  }
0x110b   : > { %v2157_v15 = vpop.permute.xlu1 %2156 }
0x110c   : > { %v2162_v17 = vsel %vm1162_vm5, %v2157_v15, 0  ;;  %v3152_v15 = vld [vmem:[%s3948_s15 + $0x78] sm:$0xff]  }
0x110d   : > { %3007 = vmatpush3.bf16.msra.mxu1 %v2162_v17  ;;  %v2755_v17 = vld [vmem:[%s3947_s14 + $0x1] ss:$0 sm:$0xff] }
0x110e   : > { %3020 = vmatprep.subr.bf16.mxu1 %v3272_v45 }
0x1110   : > { %3009 = vmatmul.mubr.msk.bf16.vlgmr.msra.gmra.mrb[48].mxu1 %vm910_vm3, %v2155_v18 }
0x1111   : > { %3024 = vmatprep.mubr.msk.bf16.mxu1 %vm3273_vm2, %v3272_v45 }
0x1112   : > { %v3198_v19 = vpop.eup %3197 }
0x1113   : > { %v2006_v20 = vmul.f32 %v3198_v19, %v3190_v62  ;;  %v3144_v62 = vld [vmem:[%s3946_s13 + $0x18] sm:$0xff]  }
0x1115   : > { %v2106_v21 = vpack.c.bf16 %v2006_v20, %v2006_v20 }
0x1117   : > { %3003 = vmatmul.mubr.msk.bf16.vlgmr.msra.gmra.mrb[32].mxu0 %vm910_vm3, %v2106_v21 }
0x1118   : > { %3016 = vmatprep.mubr.msk.bf16.mxu0 %vm3273_vm2, %v3272_v45  ;;  %3013 = vmatpush3.bf16.msra.mxu0 %v3141_v30 }
0x1119   : > { %3014 = vmatprep.subr.bf16.mxu0 %v3272_v45 }
0x111c   : > { %3015 = vmatpush3.bf16.msra.mxu0 %v3142_v31  ;;  %v2785_v31 = vld [vmem:[%s3949_s16 + $0x1] ss:$0 sm:$0xff] }
0x111d   : > { %3028 = vmatprep.subr.bf16.mxu0 %v3272_v45 }
0x11b5   : > { %v2051_v22 = vpop.f32.mrb[28].mxu0 }
0x11b6   : > { %v2992_v23 = vpop.f32.mrb[29].mxu0 }
0x11b7   : > { %v2054_v24 = vpop.f32.mrb[30].mxu0 }
0x11b8   : > { %v2993_v25 = vpop.f32.mrb[31].mxu0 }
0x11cd   : > { %v2100_v26 = vpop.f32.mrb[44].mxu1 }
0x11ce   : > { %2205 = vrot.lane.b32.xlu1 %v2100_v26, %s3996_s24  ;;  %v2998_v27 = vpop.f32.mrb[45].mxu1  ;;  %s2789_s24 = sshll.u32 %s3416_s2, 4  ;;  %s3289_s2 = smov [#allocation2]  }
0x11cf   : > { %v2103_v28 = vpop.f32.mrb[46].mxu1  ;;  %s3893_s27 = scalar_lea.hbm %s3999_s20, %s2789_s24  ;;  %s3211_s29 = sshll.u32 %s3289_s2, 4  ;;  %s3212_s29 = int_to_ptr.vmem [resolvable:$false] %s3211_s29 }
0x11d0   : > { %v2999_v29 = vpop.f32.mrb[47].mxu1  ;;  %s3213_s25 = scalar_lea.vmem %s3212_s29, 32  ;;  %p3214_p0 = scmp.lt.s32.totalorder %s3888_s28, %s3212_s29 }
0x11e3   : > { %v2198_v32 = vpop.f32.mrb[48].mxu1 }
0x11e4   : > { %2213 = vrot.lane.b32.xlu1 %v2198_v32, %s3997_s0  ;;  %v3010_v33 = vpop.f32.mrb[49].mxu1  ;;  %s2594_s0 = scalar_lea.sflag [#allocation3], %s620_s26 }
0x11e5   : > { %v2201_v34 = vpop.f32.mrb[50].mxu1 }
0x11e6   : > { %v3011_v35 = vpop.f32.mrb[51].mxu1 }
0x11ea   : > { %v2149_v36 = vpop.f32.mrb[32].mxu0 }
0x11eb   : > { %v3004_v38 = vpop.f32.mrb[33].mxu0  ;;  %2209 = vrot.lane.b32.xlu0 %v2149_v36, %s3998_s23  ;;  %s3207_s23 = scalar_lea.vmem %s3888_s28, 16 }
0x11ec   : > { %v2152_v40 = vpop.f32.mrb[34].mxu0  ;;  %p3208_p11 = scmp.ne.s32.totalorder %s3888_s28, %s3207_s23  ;;  %p3215_p1 = scmp.lt.s32.totalorder %s3213_s25, %s3207_s23 }
0x11ed   : > { %v3005_v41 = vpop.f32.mrb[35].mxu0 }
0x11ee   : > { %p3209_p12 = pnand %p3208_p11, %p3433_p5  ;;  %p3216_p2 = por %p3215_p1, %p3214_p0 }
0x11f0   : > { %p3210_p13 = pneg %p3209_p12 }
0x11f2   : > { %p3217_p3 = pnand %p3216_p2, %p3210_p13 }
0x1240   : > { %v2206_v42 = vpop.permute.xlu1 %2205 }
0x1241   : > { %v2216_v43 = vsel %vm910_vm3, %v2051_v22, %v2206_v42 }
0x1256   : > { %v2214_v46 = vpop.permute.xlu1 %2213 }
0x125d   : > { %v2210_v44 = vpop.permute.xlu0 %2209 }
0x125e   : > { %v2217_v47 = vsel %vm1366_vm6, %v2216_v43, %v2210_v44 }
0x125f   : > { %v2218_v16 = vsel %vm1368_vm7, %v2217_v47, %v2214_v46  ;;  %v3153_v46 = vld [vmem:[%s3952_s19] sm:$0xff]   ;;  %v3154_v47 = vld [vmem:[%s3952_s19 + $0x8] sm:$0xff]  }
0x1260   : > { %v2224_v48 = vpack.c.bf16 %v2218_v16, %v2218_v16 }
0x1262   : > { %3017 = vmatmul.mubr.msk.bf16.vlgmr.msra.gmra.mrb[36].mxu0 %vm775_vm1, %v2224_v48 }
0x1263   : > { %3044 = vmatprep.mubr.msk.bf16.mxu0 %vm3273_vm2, %v3272_v45  ;;  %3029 = vmatpush3.bf16.msra.mxu0 %v3145_v9 }
0x1264   : > { %3030 = vmatprep.subr.bf16.mxu0 %v3272_v45 }
0x1267   : > { %3031 = vmatpush3.bf16.msra.mxu0 %v3146_v10 }
0x1268   : > { %3032 = vmatprep.subr.bf16.mxu0 %v3272_v45 }
0x126b   : > { %3033 = vmatpush3.bf16.msra.mxu0 %v3147_v11 }
0x126c   : > { %3034 = vmatprep.subr.bf16.mxu0 %v3272_v45 }
0x126f   : > { %3035 = vmatpush3.bf16.msra.mxu0 %v3148_v63 }
0x1270   : > { %3036 = vmatprep.subr.bf16.mxu0 %v3272_v45 }
0x1273   : > { %3037 = vmatpush3.bf16.msra.mxu0 %v3149_v12 }
0x1274   : > { %3038 = vmatprep.subr.bf16.mxu0 %v3272_v45 }
0x1277   : > { %3039 = vmatpush3.bf16.msra.mxu0 %v3150_v13 }
0x1278   : > { %3040 = vmatprep.subr.bf16.mxu0 %v3272_v45 }
0x127b   : > { %3041 = vmatpush3.bf16.msra.mxu0 %v3151_v14 }
0x127c   : > { %3042 = vmatprep.subr.bf16.mxu0 %v3272_v45 }
0x127f   : > { %3043 = vmatpush3.bf16.msra.mxu0 %v3152_v15 }
0x1335   : > { %v2274_v49 = vpop.f32.mrb[36].mxu0 }
0x1336   : > { %v2280_v51 = vadd.f32 %v2274_v49, %v3691_v39  ;;  %v3018_v52 = vpop.f32.mrb[37].mxu0  ;;  %v3143_v39 = vld [vmem:[%s3946_s13 + $0x10] sm:$0xff]  }
0x1337   : > { %v2277_v53 = vpop.f32.mrb[38].mxu0  ;;  %3021 = vmatpush3.bf16.msra.mxu1 %v3143_v39 }
0x1338   : > { %v3811_v54 = vadd.f32 %v2745_v50, %v2280_v51  ;;  %v3019_v55 = vpop.f32.mrb[39].mxu0  ;;  %3022 = vmatprep.subr.bf16.mxu1 %v3272_v45  ;;  %v2514_v51 = vld [vmem:[%s3950_s17] sm:$0x1] }
0x1339   : > { %v2515_v53 = vld [vmem:[%s3951_s18] sm:$0x1] }
0x133a   : > { %v2294_v56 = vsel %vm775_vm1, %v3811_v54, 0.0 }
0x133b   : > { %2295 = vadd.xlane.f32.xlu0 %v2294_v56  ;;  %3023 = vmatpush3.bf16.msra.mxu1 %v3144_v62 }
0x133c   : > { %3048 = vmatprep.subr.bf16.mxu1 %v3272_v45 }
0x13c8   : > { %v2296_v57 = vpop.xlane.xlu0 %2295 }
0x13c9   : > { %v2297_v58 = vmul.f32 0.03125, %v2296_v57 }
0x13cb   : > { %v2298_v59 = vsub.f32 %v3811_v54, %v2297_v58 }
0x13cd   : > { %v2299_v60 = vmul.f32 %v2298_v59, %v2298_v59 }
0x13cf   : > { %v2300_v61 = vsel %vm775_vm1, %v2299_v60, 0.0 }
0x13d0   : > { %2301 = vadd.xlane.f32.xlu1 %v2300_v61 }
0x145d   : > { %v2302_v0 = vpop.xlane.xlu1 %2301 }
0x145e   : > { %v2303_v37 = vmul.f32 0.03125, %v2302_v0 }
0x1460   : > { %v2304_v1 = vadd.f32 1e-05, %v2303_v37 }
0x1462   : > { %3199 = vrsqrt.f32 %v2304_v1 }
0x146c   : > { %v3200_v3 = vpop.eup %3199 }
0x146d   : > { %v2306_v5 = vmul.f32 %v3200_v3, %v2298_v59 }
0x146f   : > { %v2313_v7 = vmul.f32 %v2748_v4, %v2306_v5 }
0x1471   : > { %v2320_v8 = vadd.f32 %v2749_v6, %v2313_v7 }
0x1473   : > { %v2326_v2 = vpack.c.bf16 %v2320_v8, %v2320_v8 }
0x1475   : > { %3025 = vmatmul.mubr.msk.bf16.vlgmr.msra.gmra.mrb[52].mxu1 %vm775_vm1, %v2326_v2 }
0x1476   : > { %3052 = vmatprep.mubr.msk.bf16.mxu1 %vm3273_vm2, %v3272_v45  ;;  %3049 = vmatpush3.bf16.msra.mxu1 %v3153_v46 }
0x1477   : > { %3050 = vmatprep.subr.bf16.mxu1 %v3272_v45 }
0x147a   : > { %3051 = vmatpush3.bf16.msra.mxu1 %v3154_v47 }
0x1548   : > { %v2384_v18 = vpop.f32.mrb[52].mxu1 }
0x1549   : > { %v2385_v19 = vadd.f32 %v2755_v17, %v2384_v18  ;;  %v3026_v20 = vpop.f32.mrb[53].mxu1 }
0x154a   : > { %v2387_v21 = vpop.f32.mrb[54].mxu1 }
0x154b   : > { %v2759_v22 = vmul.f32 -1.702, %v2385_v19  ;;  %v3027_v23 = vpop.f32.mrb[55].mxu1 }
0x154d   : > { %v2392_v24 = vmul.f32 1.442695, %v2759_v22 }
0x154f   : > { %3201 = vpow2.f32 %v2392_v24 }
0x1559   : > { %v3202_v25 = vpop.eup %3201 }
0x155a   : > { %v2394_v26 = vadd.f32 1.0, %v3202_v25 }
0x155c   : > { %3203 = vrcp.f32 %v2394_v26 }
0x1566   : > { %v3204_v27 = vpop.eup %3203 }
0x1567   : > { %v2397_v28 = vmul.f32 %v3204_v27, %v2385_v19 }
0x1569   : > { %v2415_v29 = vpack.c.bf16 %v2397_v28, %v2397_v28 }
0x156b   : > { %3045 = vmatmul.mubr.bf16.vlgmr.msra.gmra.mrb[40].mxu0 %v2415_v29 }
0x163e   : > { %v2498_v30 = vpop.f32.mrb[40].mxu0 }
0x163f   : > { %v2504_v32 = vadd.f32 %v2498_v30, %v3811_v54  ;;  %v3046_v33 = vpop.f32.mrb[41].mxu0 }
0x1640   : > { %v2501_v34 = vpop.f32.mrb[42].mxu0 }
0x1641   : > { %v3047_v35 = vpop.f32.mrb[43].mxu0  ;;  %v2513_v36 = vadd.f32 %v2785_v31, %v2504_v32 }
0x1643   : > { %v2517_v38 = vsel %vm2516_vm8, %v2513_v36, 0.0 }
0x1644   : > { %2518 = vadd.xlane.f32.xlu0 %v2517_v38 }
0x16d1   : > { %v2519_v40 = vpop.xlane.xlu0 %2518 }
0x16d2   : > { %v2520_v41 = vmul.f32 0.03125, %v2519_v40 }
0x16d4   : > { %v2521_v42 = vsub.f32 %v2513_v36, %v2520_v41 }
0x16d6   : > { %v2522_v43 = vmul.f32 %v2521_v42, %v2521_v42 }
0x16d8   : > { %v2523_v44 = vsel %vm2516_vm8, %v2522_v43, 0.0 }
0x16d9   : > { %2524 = vadd.xlane.f32.xlu0 %v2523_v44 }
0x1766   : > { %v2525_v16 = vpop.xlane.xlu0 %2524 }
0x1767   : > { %v2526_v48 = vmul.f32 0.03125, %v2525_v16 }
0x1769   : > { %v2527_v49 = vadd.f32 1e-05, %v2526_v48 }
0x176b   : > { %3205 = vrsqrt.f32 %v2527_v49 }
0x1775   : > { %v3206_v50 = vpop.eup %3205 }
0x1776   : > { %v2529_v52 = vmul.f32 %v3206_v50, %v2521_v42 }
0x1778   : > { %v2530_v54 = vmul.f32 %v2529_v52, %v2514_v51 }
0x177a   : > { %v2531_v55 = vadd.f32 %v2530_v54, %v2515_v53 }
0x177c   : > { %v2536_v45 = vpack.c.bf16 %v2531_v55, %v2531_v55 }
0x177e   : > { %3053 = vmatmul.mubr.msk.bf16.vlgmr.msra.gmra.mrb[56].mxu1 %vm775_vm1, %v2536_v45 }
0x1851   : > { %v2586_v56 = vpop.f32.mrb[56].mxu1 }
0x1852   : > { %2592 = vst [vmem:[%s621_s3] sm:$0x1] %v2586_v56  ;;  %v3054_v57 = vpop.f32.mrb[57].mxu1 }
0x1853   : > { %v2589_v58 = vpop.f32.mrb[58].mxu1 }
0x1854   : > { %3220 = shalt.err (!%p3217_p3)
}
0x1855   : > { %s3221_s26 = scalar_lea.hbm %s3893_s27, 16  ;;  %s3225_s1 = scalar_lea.hbm %s3999_s20, 32 }
0x1856   : > { %p3222_p4 = scmp.ne.s32.totalorder %s3893_s27, %s3221_s26  ;;  %p3226_p9 = scmp.lt.u32.totalorder %s3893_s27, %s3999_s20 }
0x1857   : > { %p3227_p10 = scmp.lt.u32.totalorder %s3225_s1, %s3221_s26  ;;  %p3229_p12 = scmp.lt.u32.totalorder %s3221_s26, %s3893_s27 }
0x1858   : > { %p3223_p7 = pnand %p3222_p4, %p3433_p5 }
0x1859   : > { %p3228_p11 = por %p3227_p10, %p3226_p9 }
0x185a   : > { %p3224_p8 = pneg %p3223_p7 }
0x185b   : > { %p3230_p13 = por %p3229_p12, %p3228_p11 }
0x185d   : > { %p3231_p0 = pnand %p3230_p13, %p3224_p8 }
0x185f   : > { %3234 = shalt.err (!%p3231_p0)
}
0x1860   : > { %3056 = dma.vmem_to_hbm [thread:$0]  (%p3433_p5), %s3888_s28, 16, %s3893_s27, %s2594_s0   ;;  %v3055_v59 = vpop.f32.mrb[59].mxu1 }
0x1861 PF: > { %s4000_s23 = sld [smem:[#allocation7_spill]]  ;;  %s4001_s29 = sld [smem:[#allocation5_spill]] }
0x1867   : > { %p3062_p1 = scmp.ge.s32.totalorder %s4000_s23, 2  ;;  %s2618_s3 = sand.u32 1, %s4001_s29  }
0x1868   : > { %s2619_s24 = scalar_lea.sflag [#allocation3], %s2618_s3 }
0x1869   : > { %p3059_p2 = pnand %p3062_p1, %p3437_p6 }
0x186b   : > { %3252 = dma.done.wait (!%p3059_p2), %s2619_s24, 16  }
0x186c   : > { %3254 = vsyncadd (!%p3059_p2), %s2619_s24, 4294967280  ;;  %s4003_s24 = sld [smem:[#allocation8_spill]]  ;;  %s4004_s26 = sld [smem:[#allocation6_spill]] }
0x186d   : > { %s4005_s23 = sld [smem:[#allocation9_spill]]  ;;  %s4006_s1 = smov %s3261_s22 }
0x1872   : > { %p30_p3 = scmp.ge.s32.totalorder %s4003_s24, 4   ;;  %s4007_s22 = smov %s4004_s26 }
0x1874   :  { %32 = sbr.rel (!%p30_p3) target bundleno = 10 (0xa), region = 147 }
0x187b   :  { %2623 = vsyncpa [#allocation3], 1 }
0x187c   :  { %2625 = vsyncpa [#allocation3 + $0x1], 1 }

</bundles_post_ra>
